<compile_context>
chip_gen: v5e
topology: v5e:2x2
jax: 0.10.0
libtpu: 0.0.40
codegen_flags: <defaults>
</compile_context>

<pallas_src>
import jax
import jax.numpy as jnp
from jax.experimental import pallas as pl
from jax.experimental.pallas import tpu as pltpu


def sum_sigmoids_kernel(th_ref, x_ref, o_ref):
    # th_ref: SMEM (3*m,) f32 flat: [a'_0..a'_{m-1}, b'_0..b'_{m-1}, c_0..c_{m-1}]
    # x_ref:  VMEM (TR, L) f32 lane-dense slab of samples
    # o_ref:  VMEM (TR, L) f32 lane-dense slab of outputs
    m = th_ref.shape[0] // 3
    x = x_ref[...]                               # (TR, L)

    # j = 0 term initializes the accumulator directly (saves a zeros + add).
    z = x * th_ref[0] + th_ref[m]                # VPU
    acc = th_ref[2 * m] * jnp.exp(-(z * z))      # EUP exp + VPU scale

    for j in range(1, m):                        # m is tiny & static -> unrolled
        z = x * th_ref[j] + th_ref[m + j]
        acc = acc + th_ref[2 * m + j] * jnp.exp(-(z * z))

    o_ref[...] = acc                             # full-width lane-dense store


def _round_up(v, mult):
    return ((v + mult - 1) // mult) * mult


def _sum_sigmoids_xla(x, thetas):
    # Fused pure-XLA path (also used for the ragged tail): identical math to the
    # PyTorch reference (x is (N,1), so mm(x, a) == broadcast multiply).
    a = thetas[:, 0][None, :]
    b = thetas[:, 1][None, :]
    c = thetas[:, 2][None, :]
    z = x * a + b                                # (N, m)
    return jnp.sum(c * jnp.exp(-0.5 * z * z), axis=1, keepdims=True)


def sum_sigmoids(x, thetas, *, lanes=512, max_tile_rows=1024,
                 min_kernel_elems=65536):
    """x: (N, 1) f32, thetas: (m, 3) f32 -> (N, 1) f32."""
    N = x.shape[0]
    x = x.astype(jnp.float32)
    thetas = thetas.astype(jnp.float32)

    # Small inputs: launch overhead + layout plumbing would dominate; let XLA
    # fuse the whole thing into one pass.
    if N < min_kernel_elems:
        return _sum_sigmoids_xla(x, thetas)

    m = thetas.shape[0]

    # Fold -0.5 into a and b:  exp(-0.5*(x*a+b)^2) == exp(-((x*a'+b')^2)),
    # a' = a*sqrt(.5), b' = b*sqrt(.5).  Flat (3m,) layout keeps SMEM padding tiny.
    s = jnp.sqrt(jnp.float32(0.5))
    th = jnp.concatenate(
        [thetas[:, 0] * s, thetas[:, 1] * s, thetas[:, 2]]
    ).astype(jnp.float32)                        # (3*m,)

    # Aligned prefix: a free reshape, no padding copy.
    n_main = (N // lanes) * lanes
    rows = n_main // lanes

    # Tile-row choice: cap at max_tile_rows (2 MiB block), but guarantee >= 2
    # grid steps when rows allow it so both v7x TensorCores get work.
    if rows >= 2 * max_tile_rows:
        tile_rows = max_tile_rows
    elif rows >= 16:
        tile_rows = min(max_tile_rows, _round_up(pl.cdiv(rows, 2), 8))
    else:
        tile_rows = rows                         # block dim == full array dim

    grid = (pl.cdiv(rows, tile_rows),)           # partial last block is masked

    x_main = x[:n_main].reshape(rows, lanes)

    out_main = pl.pallas_call(
        sum_sigmoids_kernel,
        out_shape=jax.ShapeDtypeStruct((rows, lanes), jnp.float32),
        grid_spec=pltpu.PrefetchScalarGridSpec(
            num_scalar_prefetch=1,               # thetas -> SMEM
            grid=grid,
            in_specs=[
                pl.BlockSpec((tile_rows, lanes), lambda i, th: (i, 0)),
            ],
            out_specs=pl.BlockSpec((tile_rows, lanes), lambda i, th: (i, 0)),
        ),
        compiler_params=pltpu.CompilerParams(
            dimension_semantics=("parallel",),
        ),
    )(th, x_main)

    out_main = out_main.reshape(n_main, 1)
    if n_main == N:
        return out_main

    # Ragged tail (< lanes elements): plain jnp, then concatenate.
    tail = _sum_sigmoids_xla(x[n_main:], thetas)
    return jnp.concatenate([out_main, tail], axis=0)


def sum_sigmoids_ref(x, thetas):
    a = thetas[:, 0][None, :]                    # (1, m)
    b = thetas[:, 1][None, :]
    c = thetas[:, 2][None, :]
    z = x @ a + b                                # torch.mm(x, a) + b
    return jnp.sum(c * jnp.exp(-0.5 * z ** 2), axis=1, keepdims=True)


if __name__ == "__main__":
    key = jax.random.PRNGKey(0)
    k_x, k_th = jax.random.split(key)

    m = 3
    thetas = jax.random.normal(k_th, (m, 3), dtype=jnp.float32)

    # Case 1: small N -> fused XLA fallback path.
    N_small = 1000
    x_small = jax.random.normal(k_x, (N_small, 1), dtype=jnp.float32)
    out_small = jax.block_until_ready(sum_sigmoids(x_small, thetas))
    ref_small = sum_sigmoids_ref(x_small, thetas)
    assert out_small.shape == (N_small, 1)
    assert jnp.allclose(out_small, ref_small, atol=1e-5, rtol=1e-5)

    # Case 2: lane-aligned N -> pure Pallas kernel path (no pad, no tail).
    N_aligned = 256 * 512                        # 131072 -> rows=256, grid=(2,)
    x_al = jax.random.normal(k_x, (N_aligned, 1), dtype=jnp.float32)
    out_al = jax.block_until_ready(sum_sigmoids(x_al, thetas))
    ref_al = sum_sigmoids_ref(x_al, thetas)
    assert out_al.shape == (N_aligned, 1)
    assert jnp.allclose(out_al, ref_al, atol=1e-5, rtol=1e-5)

    # Case 3: ragged N -> kernel on the aligned prefix + jnp tail.
    N_ragged = 256 * 512 + 137
    x_rg = jax.random.normal(k_x, (N_ragged, 1), dtype=jnp.float32)
    out_rg = jax.block_until_ready(sum_sigmoids(x_rg, thetas))
    ref_rg = sum_sigmoids_ref(x_rg, thetas)
    assert out_rg.shape == (N_ragged, 1)
    assert jnp.allclose(out_rg, ref_rg, atol=1e-5, rtol=1e-5)

    print("KERNEL_OK")
</pallas_src>

<mosaic_0001>
module attributes {stable_mosaic.version = 11 : i64} {
  func.func @sum_sigmoids_kernel(%arg0: i32, %arg1: memref<9xf32, #tpu.memory_space<smem>>, %arg2: memref<128x512xf32, #tpu.memory_space<vmem>>, %arg3: memref<128x512xf32, #tpu.memory_space<vmem>>) attributes {dimension_semantics = [#tpu.dimension_semantics<parallel>], iteration_bounds = array<i64: 2>, scalar_prefetch = 1 : i64, scratch_operands = 0 : i64, tpu.core_type = #tpu.core_type<tc>, window_params = [{transform_indices = @transform_0, window_bounds = array<i64: 128, 512>}, {transform_indices = @transform_1, window_bounds = array<i64: 128, 512>}]} {
    %c0 = arith.constant 0 : index
    %c0_0 = arith.constant 0 : index
    %0 = vector.load %arg2[%c0, %c0_0] : memref<128x512xf32, #tpu.memory_space<vmem>>, vector<128x512xf32>
    %c0_1 = arith.constant 0 : index
    %1 = memref.load %arg1[%c0_1] : memref<9xf32, #tpu.memory_space<smem>>
    %2 = vector.broadcast %1 : f32 to vector<128x512xf32>
    %3 = arith.mulf %0, %2 : vector<128x512xf32>
    %c3 = arith.constant 3 : index
    %4 = memref.load %arg1[%c3] : memref<9xf32, #tpu.memory_space<smem>>
    %5 = vector.broadcast %4 : f32 to vector<128x512xf32>
    %6 = arith.addf %3, %5 : vector<128x512xf32>
    %c6 = arith.constant 6 : index
    %7 = memref.load %arg1[%c6] : memref<9xf32, #tpu.memory_space<smem>>
    %8 = arith.mulf %6, %6 : vector<128x512xf32>
    %cst = arith.constant 0.000000e+00 : f32
    %9 = vector.broadcast %cst : f32 to vector<128x512xf32>
    %10 = arith.subf %9, %8 : vector<128x512xf32>
    %11 = math.exp %10 : vector<128x512xf32>
    %12 = vector.broadcast %7 : f32 to vector<128x512xf32>
    %13 = arith.mulf %12, %11 : vector<128x512xf32>
    %c1 = arith.constant 1 : index
    %14 = memref.load %arg1[%c1] : memref<9xf32, #tpu.memory_space<smem>>
    %15 = vector.broadcast %14 : f32 to vector<128x512xf32>
    %16 = arith.mulf %0, %15 : vector<128x512xf32>
    %c4 = arith.constant 4 : index
    %17 = memref.load %arg1[%c4] : memref<9xf32, #tpu.memory_space<smem>>
    %18 = vector.broadcast %17 : f32 to vector<128x512xf32>
    %19 = arith.addf %16, %18 : vector<128x512xf32>
    %c7 = arith.constant 7 : index
    %20 = memref.load %arg1[%c7] : memref<9xf32, #tpu.memory_space<smem>>
    %21 = arith.mulf %19, %19 : vector<128x512xf32>
    %cst_2 = arith.constant 0.000000e+00 : f32
    %22 = vector.broadcast %cst_2 : f32 to vector<128x512xf32>
    %23 = arith.subf %22, %21 : vector<128x512xf32>
    %24 = math.exp %23 : vector<128x512xf32>
    %25 = vector.broadcast %20 : f32 to vector<128x512xf32>
    %26 = arith.mulf %25, %24 : vector<128x512xf32>
    %27 = arith.addf %13, %26 : vector<128x512xf32>
    %c2 = arith.constant 2 : index
    %28 = memref.load %arg1[%c2] : memref<9xf32, #tpu.memory_space<smem>>
    %29 = vector.broadcast %28 : f32 to vector<128x512xf32>
    %30 = arith.mulf %0, %29 : vector<128x512xf32>
    %c5 = arith.constant 5 : index
    %31 = memref.load %arg1[%c5] : memref<9xf32, #tpu.memory_space<smem>>
    %32 = vector.broadcast %31 : f32 to vector<128x512xf32>
    %33 = arith.addf %30, %32 : vector<128x512xf32>
    %c8 = arith.constant 8 : index
    %34 = memref.load %arg1[%c8] : memref<9xf32, #tpu.memory_space<smem>>
    %35 = arith.mulf %33, %33 : vector<128x512xf32>
    %cst_3 = arith.constant 0.000000e+00 : f32
    %36 = vector.broadcast %cst_3 : f32 to vector<128x512xf32>
    %37 = arith.subf %36, %35 : vector<128x512xf32>
    %38 = math.exp %37 : vector<128x512xf32>
    %39 = vector.broadcast %34 : f32 to vector<128x512xf32>
    %40 = arith.mulf %39, %38 : vector<128x512xf32>
    %41 = arith.addf %27, %40 : vector<128x512xf32>
    %c0_4 = arith.constant 0 : index
    %c0_5 = arith.constant 0 : index
    %42 = vector.load %arg3[%c0_4, %c0_5] : memref<128x512xf32, #tpu.memory_space<vmem>>, vector<128x512xf32>
    tpu.vector_store %arg3[%c0_4, %c0_5], %41 {strides = array<i32>} : memref<128x512xf32, #tpu.memory_space<vmem>>, vector<128x512xf32>,
    return
  }
  func.func @transform_0(%arg0: i32, %arg1: memref<9xf32, #tpu.memory_space<smem>>) -> (i32, i32) {
    %c0_i32 = arith.constant 0 : i32
    %c0_i32_0 = arith.constant 0 : i32
    return %arg0, %c0_i32 : i32, i32
  }
  func.func @transform_1(%arg0: i32, %arg1: memref<9xf32, #tpu.memory_space<smem>>) -> (i32, i32) {
    %c0_i32 = arith.constant 0 : i32
    %c0_i32_0 = arith.constant 0 : i32
    return %arg0, %c0_i32 : i32, i32
  }
}

</mosaic_0001>

<bundles_post_ra>
// kernel: tpu_custom_call.1
= control target key start
LH: loop header
LB: loop body
LE: loop exit
PB: predicated region body
PF: predicated region fallthrough
CT: control target
= control target key end

     0   :  { %s2432_s12 = smov [#allocation3]   ;;  %s3331_s0 = inlined_call_operand.hbm [shape: f32[9], index: 0, kind: input, shape index: {}]   ;;  %s3332_s1 = inlined_call_operand.hbm [shape: f32[256,512], index: 1, kind: input, shape index: {}]   ;;  %s3333_s2 = inlined_call_operand.hbm [shape: f32[256,512], index: 2, kind: output, shape index: {}]  }
   0x1   :  { %s8_s11 = sshll.u32 %s3331_s0, 4  ;;  %s9_s11 = int_to_ptr.hbm [resolvable:$true] %s8_s11 }
   0x2   :  { %11 = dma.hbm_to_smem %s9_s11, 16, %s2432_s12, [#allocation2] }
   0x3   :  { %2406 = dma.done.wait [#allocation2], 16 }
   0x4   :  { %2407 = vsyncadd [#allocation2], 4294967280 }
   0x5   :  { %14 = sfence }
   0x6   :  { %15 = vsyncpa [#allocation5], 0 }
   0x7   :  { %17 = vsyncpa [#allocation5 + $0x1], 0 }
   0x8   :  { %18 = vsyncpa [#allocation6], 0 }
   0x9   :  { %20 = vsyncpa [#allocation6 + $0x1], 0  ;;  %s2455_s13 = smov 0   ;;  %s2457_s14 = smov 0  }
   0xa   :  { %s2459_s15 = smov 0   ;;  %s2461_s16 = smov 0  }
   0xb LB: > { %s2476_s0 = sadd.s32 4294967295, %s2430_s16   ;;  %s1857_s17 = sadd.s32 4294967294, %s2430_s16   ;;  %s2430_s16 = sphi %s2461_s16, %s3343_s16   ;;  %s2426_s15 = sphi %s2459_s15, %s3342_s15   ;;  %s2422_s14 = sphi %s2457_s14, %s3341_s14   ;;  %s2418_s13 = sphi %s2455_s13, %s3340_s13  }
   0xc   : > { %s2480_s18 = sadd.s32 1, %s2430_s16   ;;  %s33_s19 = sadd.s32 1, %s2426_s15 }
   0xd   : > { %s30_s20 = ssub.s32 %s2430_s16, %s2480_s18  ;;  %p40_p0 = scmp.ne.s32.totalorder %s2426_s15, %s2422_s14 }
   0xe   : > { %p31_p1 = scmp.eq.s32.totalorder %s30_s20, 0  ;;  %p41_p2 = scmp.eq.s32.totalorder %s2430_s16, 0 }
   0xf   : > { %p46_p3 = scmp.ne.s32.totalorder %s2422_s14, %s2418_s13  ;;  %p47_p4 = scmp.eq.s32.totalorder %s2476_s0, 0 }
  0x10   : > { %s2492_s21 = scalar_select %p31_p1, %s2426_s15, %s33_s19  }
  0x11   : > { %p2494_p5 = por %p41_p2, %p40_p0  ;;  %p2498_p6 = por %p47_p4, %p46_p3 }
  0x12   : > { %p70_p7 = scmp.eq.s32.totalorder %s2476_s0, 1  ;;  %p76_p8 = scmp.eq.s32.totalorder %s1857_s17, 1 }
  0x13   : > { %p1897_p10 = scmp.lt.s32.totalorder %s2430_s16, 2  ;;  %s96_s26 = sand.u32 1, %s2426_s15  }
  0x14   : > { %p2505_p11 = por %p70_p7, %p40_p0  ;;  %p2509_p12 = por %p76_p8, %p46_p3 }
  0x15   : > { %s1882_s27 = sshll.u32 %s2430_s16, 9  ;;  %s1860_s28 = sshll.u32 %s96_s26, 9 }
  0x16   : > { %s106_s3 = scalar_lea.hbm %s3332_s1, %s1882_s27  ;;  %s100_s5 = scalar_lea.vmem [#allocation4], %s1860_s28 }
  0x17   : > { %s107_s4 = sshll.u32 %s106_s3, 4  ;;  %s109_s6 = sshll.u32 %s100_s5, 4  ;;  %s108_s4 = int_to_ptr.hbm [resolvable:$true] %s107_s4  ;;  %s110_s6 = int_to_ptr.vmem [resolvable:$true] %s109_s6 }
  0x18   : > { %p2520_p13 = pnand %p1897_p10, %p2494_p5  ;;  %p1864_p0 = scmp.ge.s32.totalorder %s2430_s16, 1 }
  0x19   : > { %p117_p1 = scmp.lt.s32.totalorder %s2430_s16, 3  ;;  %s97_s8 = scalar_lea.sflag [#allocation5], %s96_s26 }
  0x1a   : > { %s2332_s9 = sshra.s32 %s108_s4, 4  ;;  %p2336_p3 = pneg %p2520_p13  ;;  %s2333_s9 = int_to_ptr.hbm [resolvable:$true] %s2332_s9 }
  0x1b   : > { %s2334_s10 = scalar_lea.hbm %s2333_s9, 512  ;;  %s2339_s17 = scalar_lea.hbm %s3332_s1, 1024 }
  0x1c   : > { %p2335_p2 = scmp.ne.s32.totalorder %s2333_s9, %s2334_s10  ;;  %p2340_p5 = scmp.lt.s32.totalorder %s2333_s9, %s3332_s1 }
  0x1d   : > { %p2341_p8 = scmp.lt.s32.totalorder %s2339_s17, %s2334_s10 }
  0x1e   : > { %p2337_p4 = pnand %p2336_p3, %p2335_p2 }
  0x1f   : > { %p2342_p10 = por %p2341_p8, %p2340_p5 }
  0x20   : > { %p2338_p7 = pneg %p2337_p4 }
  0x22   : > { %p2343_p9 = pnand %p2342_p10, %p2338_p7 }
  0x24   : > { %2346 = shalt.err (!%p2343_p9)
}
  0x25   : > { %s2433_s22 = smov 512   ;;  %s2434_s26 = smov 32  }
  0x26   : > { %1892 = dma.hbm_to_vmem [thread:$0]  (!%p2520_p13), %s108_s4, 8192, %s110_s6, %s97_s8, %s2433_s22, %s2433_s22, %s2434_s26  }
  0x27   : > { %p118_p2 = pnand %p1864_p0, %p117_p1 }
  0x28   : > { %s2541_s27 = sand.u32 (!%p118_p2), 1, %s2422_s14  }
  0x29   : > { %121 = sbr.rel (%p118_p2) target bundleno = 442 (0x1ba), region = 24  ;;  %s1865_s28 = sshll.u32 (!%p118_p2), %s2541_s27, 9 }
  0x2a   : > { %s124_s29 = scalar_lea.sflag (!%p118_p2), [#allocation5], %s2541_s27  ;;  %s2547_s30 = scalar_lea.vmem (!%p118_p2), [#allocation4], %s1865_s28 }
  0x2e   : > { %2409 = dma.done.wait (%p2498_p6), %s124_s29, 8192  }
  0x2f   : > { %2411 = vsyncadd (%p2498_p6), %s124_s29, 4294959104  ;;  %s213_s3 = sld [smem:[#allocation3]]  ;;  %v149_v0 = vld [vmem:[%s2547_s30] sm:$0xff]  ;;  %v150_v2 = vld [vmem:[%s2547_s30 + $0x8] sm:$0xff]  ;;  %s2636_s11 = scalar_lea.vmem [#allocation7], %s1865_s28 }
  0x30   : > { %s1867_s4 = sld [smem:[#allocation3 + $0x3]]  ;;  %v151_v3 = vld [vmem:[%s2547_s30 + $0x10] sm:$0xff]  ;;  %v2564_v8 = vld [vmem:[%s2547_s30 + $0x18] sm:$0xff]  ;;  %v2567_v9 = vld [vmem:[%s2547_s30 + $0x20] sm:$0xff]  ;;  %s1884_s12 = sshll.u32 %s2476_s0, 9 }
  0x31   : > { %s1868_s5 = sld [smem:[#allocation3 + $0x6]]  ;;  %v2570_v10 = vld [vmem:[%s2547_s30 + $0x28] sm:$0xff]  ;;  %s1780_s20 = scalar_lea.hbm %s3333_s2, %s1884_s12 }
  0x32   : > { %s1869_s6 = sld [smem:[#allocation3 + $0x1]]  ;;  %s1781_s22 = sshll.u32 %s2636_s11, 4  ;;  %s1782_s22 = int_to_ptr.vmem [resolvable:$true] %s1781_s22 }
  0x33   : > { %s1870_s7 = sld [smem:[#allocation3 + $0x4]]  ;;  %s1783_s26 = sshll.u32 %s1780_s20, 4  ;;  %s1784_s26 = int_to_ptr.hbm [resolvable:$true] %s1783_s26 }
  0x34   : > { %s1871_s8 = sld [smem:[#allocation3 + $0x7]]  ;;  %s1768_s0 = scalar_lea.sflag [#allocation6], %s2541_s27 }
  0x35   : > { %v2554_v1 = vstv %s213_s3  ;;  %s1872_s9 = sld [smem:[#allocation3 + $0x2]]  ;;  %s2376_s28 = sshra.s32 %s1784_s26, 4  ;;  %s2377_s28 = int_to_ptr.hbm [resolvable:$true] %s2376_s28 }
  0x36   : > { %v215_v4 = vmul.f32 %v2554_v1, %v149_v0  ;;  %v2559_v5 = vstv %s1867_s4  ;;  %s1873_s23 = sld [smem:[#allocation3 + $0x5]]  ;;  %v216_v6 = vmul.f32 %v2554_v1, %v150_v2  ;;  %v217_v7 = vmul.f32 %v2554_v1, %v151_v3  ;;  %s2378_s29 = scalar_lea.hbm %s2377_s28, 512 }
  0x37   : > { %v2572_v11 = vstv %s1868_s5  ;;  %s1874_s10 = sld [smem:[#allocation3 + $0x8]]  ;;  %v218_v12 = vmul.f32 %v2554_v1, %v2564_v8  ;;  %v219_v13 = vmul.f32 %v2554_v1, %v2567_v9  ;;  %v2580_v14 = vmul.f32 %v2554_v1, %v2570_v10  ;;  %p2379_p6 = scmp.ne.s32.totalorder %s2377_s28, %s2378_s29 }
  0x38   : > { %v281_v15 = vadd.f32 %v2559_v5, %v215_v4  ;;  %v2583_v16 = vstv %s1869_s6  ;;  %v282_v17 = vadd.f32 %v2559_v5, %v216_v6  ;;  %v283_v18 = vadd.f32 %v2559_v5, %v217_v7  ;;  %s2382_s4 = scalar_lea.hbm %s3333_s2, 1024  ;;  %p2383_p0 = scmp.lt.s32.totalorder %s2377_s28, %s3333_s2 }
  0x39   : > { %v669_v19 = vmul.f32 %v2583_v16, %v149_v0  ;;  %v2588_v20 = vstv %s1870_s7  ;;  %v670_v21 = vmul.f32 %v2583_v16, %v150_v2  ;;  %v671_v22 = vmul.f32 %v2583_v16, %v151_v3  ;;  %p2380_p9 = pnand %p2379_p6, %p2505_p11  ;;  %p2384_p1 = scmp.lt.s32.totalorder %s2382_s4, %s2378_s29 }
  0x3a   : > { %v346_v23 = vmul.f32 %v281_v15, %v281_v15  ;;  %v2592_v24 = vstv %s1871_s8  ;;  %v347_v25 = vmul.f32 %v282_v17, %v282_v17  ;;  %v348_v26 = vmul.f32 %v283_v18, %v283_v18 }
  0x3b   : > { %v735_v27 = vadd.f32 %v2588_v20, %v669_v19  ;;  %v2595_v28 = vstv %s1872_s9  ;;  %v736_v29 = vadd.f32 %v2588_v20, %v670_v21  ;;  %v737_v30 = vadd.f32 %v2588_v20, %v671_v22  ;;  %p2381_p13 = pneg %p2380_p9  ;;  %p2385_p3 = por %p2384_p1, %p2383_p0 }
  0x3c   : > { %v410_v31 = vsub.f32 0.0, %v346_v23  ;;  %v1187_v32 = vmul.f32 %v2595_v28, %v149_v0  ;;  %v2600_v33 = vstv %s1873_s23  ;;  %v411_v34 = vsub.f32 0.0, %v347_v25 }
  0x3d   : > { %v800_v35 = vmul.f32 %v735_v27, %v735_v27  ;;  %v2602_v36 = vstv %s1874_s10  ;;  %v801_v37 = vmul.f32 %v736_v29, %v736_v29  ;;  %v1188_v38 = vmul.f32 %v2595_v28, %v150_v2  ;;  %p2386_p4 = pnand %p2385_p3, %p2381_p13 }
  0x3e   : > { %v474_v39 = vmul.f32 1.442695, %v410_v31  ;;  %v1253_v40 = vadd.f32 %v2600_v33, %v1187_v32  ;;  %v476_v41 = vmul.f32 1.442695, %v411_v34  ;;  %v412_v42 = vsub.f32 0.0, %v348_v26 }
  0x3f   : > { %v864_v43 = vsub.f32 0.0, %v800_v35  ;;  %v865_v44 = vsub.f32 0.0, %v801_v37  ;;  %v1254_v45 = vadd.f32 %v2600_v33, %v1188_v38  ;;  %v802_v46 = vmul.f32 %v737_v30, %v737_v30 }
  0x40   : > { %1936 = vpow2.f32 %v474_v39  ;;  %v1318_v47 = vmul.f32 %v1253_v40, %v1253_v40  ;;  %v478_v48 = vmul.f32 1.442695, %v412_v42  ;;  %v1189_v49 = vmul.f32 %v2595_v28, %v151_v3 }
  0x41   : > { %v928_v50 = vmul.f32 1.442695, %v864_v43  ;;  %1938 = vpow2.f32 %v476_v41  ;;  %v930_v51 = vmul.f32 1.442695, %v865_v44  ;;  %v1319_v52 = vmul.f32 %v1254_v45, %v1254_v45 }
  0x42   : > { %v1382_v53 = vsub.f32 0.0, %v1318_v47  ;;  %1940 = vpow2.f32 %v478_v48  ;;  %v866_v54 = vsub.f32 0.0, %v802_v46  ;;  %v1255_v55 = vadd.f32 %v2600_v33, %v1189_v49 }
  0x43   : > { %1942 = vpow2.f32 %v928_v50  ;;  %v1383_v56 = vsub.f32 0.0, %v1319_v52  ;;  %v284_v57 = vadd.f32 %v2559_v5, %v218_v12  ;;  %v672_v58 = vmul.f32 %v2583_v16, %v2564_v8 }
  0x44   : > { %v1446_v59 = vmul.f32 1.442695, %v1382_v53  ;;  %1944 = vpow2.f32 %v930_v51  ;;  %v932_v60 = vmul.f32 1.442695, %v866_v54  ;;  %v1320_v61 = vmul.f32 %v1255_v55, %v1255_v55 }
  0x45   : > { %v1448_v62 = vmul.f32 1.442695, %v1383_v56  ;;  %v349_v63 = vmul.f32 %v284_v57, %v284_v57  ;;  %v738_v0 = vadd.f32 %v2588_v20, %v672_v58  ;;  %v1190_v2 = vmul.f32 %v2595_v28, %v2564_v8  ;;  %v155_v58 = vld [vmem:[%s2547_s30 + $0x30] sm:$0xff] }
  0x46   : > { %v1937_v3 = vpop.eup %1936  ;;  %1946 = vpow2.f32 %v1446_v59  ;;  %v1384_v4 = vsub.f32 0.0, %v1320_v61  ;;  %v285_v6 = vadd.f32 %v2559_v5, %v219_v13  ;;  %v673_v7 = vmul.f32 %v2583_v16, %v2567_v9 }
  0x47   : > { %v1939_v12 = vpop.eup %1938  ;;  %v603_v15 = vmul.f32 %v1937_v3, %v2572_v11  ;;  %1948 = vpow2.f32 %v1448_v62  ;;  %v413_v17 = vsub.f32 0.0, %v349_v63  ;;  %v803_v18 = vmul.f32 %v738_v0, %v738_v0 }
  0x48   : > { %v1941_v19 = vpop.eup %1940  ;;  %v604_v21 = vmul.f32 %v1939_v12, %v2572_v11  ;;  %1950 = vpow2.f32 %v932_v60  ;;  %v1450_v22 = vmul.f32 1.442695, %v1384_v4  ;;  %v1256_v8 = vadd.f32 %v2600_v33, %v1190_v2 }
  0x49   : > { %v1943_v23 = vpop.eup %1942  ;;  %v605_v25 = vmul.f32 %v1941_v19, %v2572_v11  ;;  %v480_v13 = vmul.f32 1.442695, %v413_v17  ;;  %v867_v26 = vsub.f32 0.0, %v803_v18  ;;  %v350_v27 = vmul.f32 %v285_v6, %v285_v6 }
  0x4a   : > { %v1945_v29 = vpop.eup %1944  ;;  %v1057_v30 = vmul.f32 %v1943_v23, %v2592_v24  ;;  %1952 = vpow2.f32 %v1450_v22  ;;  %v1321_v31 = vmul.f32 %v1256_v8, %v1256_v8  ;;  %v739_v32 = vadd.f32 %v2588_v20, %v673_v7 }
  0x4b   : > { %v1058_v34 = vmul.f32 %v1945_v29, %v2592_v24  ;;  %1954 = vpow2.f32 %v480_v13  ;;  %v934_v35 = vmul.f32 1.442695, %v867_v26  ;;  %v414_v37 = vsub.f32 0.0, %v350_v27 }
  0x4c   : > { %v1947_v38 = vpop.eup %1946  ;;  %v1121_v39 = vadd.f32 %v1057_v30, %v603_v15  ;;  %v1385_v40 = vsub.f32 0.0, %v1321_v31  ;;  %v804_v41 = vmul.f32 %v739_v32, %v739_v32  ;;  %v1191_v42 = vmul.f32 %v2595_v28, %v2567_v9 }
  0x4d   : > { %v1949_v43 = vpop.eup %1948  ;;  %v1575_v44 = vmul.f32 %v1947_v38, %v2602_v36  ;;  %v1122_v45 = vadd.f32 %v1058_v34, %v604_v21  ;;  %1956 = vpow2.f32 %v934_v35  ;;  %v482_v46 = vmul.f32 1.442695, %v414_v37 }
  0x4e   : > { %v1951_v47 = vpop.eup %1950  ;;  %v1576_v48 = vmul.f32 %v1949_v43, %v2602_v36  ;;  %v1452_v49 = vmul.f32 1.442695, %v1385_v40  ;;  %v868_v50 = vsub.f32 0.0, %v804_v41  ;;  %v1257_v51 = vadd.f32 %v2600_v33, %v1191_v42 }
  0x4f   : > { %v1639_v52 = vadd.f32 %v1575_v44, %v1121_v39  ;;  %v1059_v53 = vmul.f32 %v1951_v47, %v2592_v24  ;;  %1958 = vpow2.f32 %v482_v46  ;;  %v286_v9 = vadd.f32 %v2559_v5, %v2580_v14 }
  0x50   : > { %v1953_v54 = vpop.eup %1952  ;;  %v1640_v55 = vadd.f32 %v1576_v48, %v1122_v45  ;;  %1960 = vpow2.f32 %v1452_v49  ;;  %v936_v56 = vmul.f32 1.442695, %v868_v50  ;;  %v1322_v57 = vmul.f32 %v1257_v51, %v1257_v51 }
  0x51   : > { %v1955_v59 = vpop.eup %1954  ;;  %1703 = vst [vmem:[%s2636_s11] sm:$0xff] %v1639_v52  ;;  %v1123_v60 = vadd.f32 %v1059_v53, %v605_v25  ;;  %v1577_v61 = vmul.f32 %v1953_v54, %v2602_v36  ;;  %v351_v62 = vmul.f32 %v286_v9, %v286_v9  ;;  %v674_v14 = vmul.f32 %v2583_v16, %v2570_v10  ;;  %v156_v25 = vld [vmem:[%s2547_s30 + $0x38] sm:$0xff]  ;;  %v157_v54 = vld [vmem:[%s2547_s30 + $0x40] sm:$0xff] }
  0x52   : > { %1704 = vst [vmem:[%s2636_s11 + $0x8] sm:$0xff] %v1640_v55  ;;  %v606_v63 = vmul.f32 %v1955_v59, %v2572_v11  ;;  %1962 = vpow2.f32 %v936_v56  ;;  %v1386_v0 = vsub.f32 0.0, %v1322_v57  ;;  %v1192_v2 = vmul.f32 %v2595_v28, %v2570_v10 }
  0x53   : > { %v1957_v3 = vpop.eup %1956  ;;  %v1641_v4 = vadd.f32 %v1577_v61, %v1123_v60  ;;  %v415_v6 = vsub.f32 0.0, %v351_v62  ;;  %v740_v7 = vadd.f32 %v2588_v20, %v674_v14  ;;  %v221_v12 = vmul.f32 %v2554_v1, %v155_v58 }
  0x54   : > { %v1060_v15 = vmul.f32 %v1957_v3, %v2592_v24  ;;  %v1454_v17 = vmul.f32 1.442695, %v1386_v0  ;;  %v1258_v18 = vadd.f32 %v2600_v33, %v1192_v2  ;;  %v675_v19 = vmul.f32 %v2583_v16, %v155_v58 }
  0x55   : > { %v1959_v21 = vpop.eup %1958  ;;  %1705 = vst [vmem:[%s2636_s11 + $0x10] sm:$0xff] %v1641_v4  ;;  %v484_v22 = vmul.f32 1.442695, %v415_v6  ;;  %v805_v8 = vmul.f32 %v740_v7, %v740_v7  ;;  %v287_v10 = vadd.f32 %v2559_v5, %v221_v12  ;;  %v1193_v23 = vmul.f32 %v2595_v28, %v155_v58 }
  0x56   : > { %v1961_v13 = vpop.eup %1960  ;;  %v1124_v26 = vadd.f32 %v1060_v15, %v606_v63  ;;  %v607_v27 = vmul.f32 %v1959_v21, %v2572_v11  ;;  %1964 = vpow2.f32 %v1454_v17  ;;  %v1323_v29 = vmul.f32 %v1258_v18, %v1258_v18 }
  0x57   : > { %v1578_v30 = vmul.f32 %v1961_v13, %v2602_v36  ;;  %1966 = vpow2.f32 %v484_v22  ;;  %v869_v31 = vsub.f32 0.0, %v805_v8  ;;  %v352_v32 = vmul.f32 %v287_v10, %v287_v10  ;;  %v158_v8 = vld [vmem:[%s2547_s30 + $0x48] sm:$0xff] }
  0x58   : > { %v1963_v34 = vpop.eup %1962  ;;  %v1387_v35 = vsub.f32 0.0, %v1323_v29  ;;  %v741_v37 = vadd.f32 %v2588_v20, %v675_v19  ;;  %v1259_v38 = vadd.f32 %v2600_v33, %v1193_v23  ;;  %v222_v39 = vmul.f32 %v2554_v1, %v156_v25 }
  0x59   : > { %v1642_v40 = vadd.f32 %v1578_v30, %v1124_v26  ;;  %v1061_v41 = vmul.f32 %v1963_v34, %v2592_v24  ;;  %v938_v42 = vmul.f32 1.442695, %v869_v31  ;;  %v416_v43 = vsub.f32 0.0, %v352_v32 }
  0x5a   : > { %v1456_v44 = vmul.f32 1.442695, %v1387_v35  ;;  %v806_v45 = vmul.f32 %v741_v37, %v741_v37  ;;  %v1324_v46 = vmul.f32 %v1259_v38, %v1259_v38  ;;  %v288_v47 = vadd.f32 %v2559_v5, %v222_v39 }
  0x5b   : > { %1706 = vst [vmem:[%s2636_s11 + $0x18] sm:$0xff] %v1642_v40  ;;  %v1125_v48 = vadd.f32 %v1061_v41, %v607_v27  ;;  %1968 = vpow2.f32 %v938_v42  ;;  %v486_v49 = vmul.f32 1.442695, %v416_v43  ;;  %v676_v50 = vmul.f32 %v2583_v16, %v156_v25 }
  0x5c   : > { %v1965_v51 = vpop.eup %1964  ;;  %1970 = vpow2.f32 %v1456_v44  ;;  %v870_v52 = vsub.f32 0.0, %v806_v45  ;;  %v1388_v53 = vsub.f32 0.0, %v1324_v46  ;;  %v353_v9 = vmul.f32 %v288_v47, %v288_v47  ;;  %v159_v46 = vld [vmem:[%s2547_s30 + $0x50] sm:$0xff] }
  0x5d   : > { %v1967_v55 = vpop.eup %1966  ;;  %v1579_v56 = vmul.f32 %v1965_v51, %v2602_v36  ;;  %1972 = vpow2.f32 %v486_v49  ;;  %v742_v57 = vadd.f32 %v2588_v20, %v676_v50  ;;  %v1194_v58 = vmul.f32 %v2595_v28, %v156_v25 }
  0x5e   : > { %v608_v59 = vmul.f32 %v1967_v55, %v2572_v11  ;;  %v940_v60 = vmul.f32 1.442695, %v870_v52  ;;  %v1458_v61 = vmul.f32 1.442695, %v1388_v53  ;;  %v417_v62 = vsub.f32 0.0, %v353_v9 }
  0x5f   : > { %v1643_v14 = vadd.f32 %v1579_v56, %v1125_v48  ;;  %v807_v63 = vmul.f32 %v742_v57, %v742_v57  ;;  %v1260_v0 = vadd.f32 %v2600_v33, %v1194_v58  ;;  %v223_v2 = vmul.f32 %v2554_v1, %v157_v54  ;;  %v160_v57 = vld [vmem:[%s2547_s30 + $0x58] sm:$0xff] }
  0x60   : > { %1974 = vpow2.f32 %v940_v60  ;;  %v488_v3 = vmul.f32 1.442695, %v417_v62  ;;  %v677_v4 = vmul.f32 %v2583_v16, %v157_v54  ;;  %v1195_v6 = vmul.f32 %v2595_v28, %v157_v54 }
  0x61   : > { %v1969_v7 = vpop.eup %1968  ;;  %1707 = vst [vmem:[%s2636_s11 + $0x20] sm:$0xff] %v1643_v14  ;;  %1976 = vpow2.f32 %v1458_v61  ;;  %v871_v12 = vsub.f32 0.0, %v807_v63  ;;  %v1325_v15 = vmul.f32 %v1260_v0, %v1260_v0  ;;  %v289_v17 = vadd.f32 %v2559_v5, %v223_v2 }
  0x62   : > { %v1971_v18 = vpop.eup %1970  ;;  %v1062_v19 = vmul.f32 %v1969_v7, %v2592_v24  ;;  %1978 = vpow2.f32 %v488_v3  ;;  %v743_v21 = vadd.f32 %v2588_v20, %v677_v4  ;;  %v1261_v22 = vadd.f32 %v2600_v33, %v1195_v6 }
  0x63   : > { %v1973_v10 = vpop.eup %1972  ;;  %v1580_v23 = vmul.f32 %v1971_v18, %v2602_v36  ;;  %v942_v25 = vmul.f32 1.442695, %v871_v12  ;;  %v1389_v13 = vsub.f32 0.0, %v1325_v15  ;;  %v354_v26 = vmul.f32 %v289_v17, %v289_v17 }
  0x64   : > { %v1126_v27 = vadd.f32 %v1062_v19, %v608_v59  ;;  %v609_v29 = vmul.f32 %v1973_v10, %v2572_v11  ;;  %v808_v30 = vmul.f32 %v743_v21, %v743_v21  ;;  %v1326_v31 = vmul.f32 %v1261_v22, %v1261_v22 }
  0x65   : > { %1980 = vpow2.f32 %v942_v25  ;;  %v1460_v32 = vmul.f32 1.442695, %v1389_v13  ;;  %v418_v34 = vsub.f32 0.0, %v354_v26  ;;  %v224_v35 = vmul.f32 %v2554_v1, %v158_v8 }
  0x66   : > { %v1975_v37 = vpop.eup %1974  ;;  %v1644_v38 = vadd.f32 %v1580_v23, %v1126_v27  ;;  %v872_v39 = vsub.f32 0.0, %v808_v30  ;;  %v1390_v40 = vsub.f32 0.0, %v1326_v31  ;;  %v678_v41 = vmul.f32 %v2583_v16, %v158_v8 }
  0x67   : > { %v1977_v42 = vpop.eup %1976  ;;  %v1063_v43 = vmul.f32 %v1975_v37, %v2592_v24  ;;  %1982 = vpow2.f32 %v1460_v32  ;;  %v490_v44 = vmul.f32 1.442695, %v418_v34  ;;  %v290_v45 = vadd.f32 %v2559_v5, %v224_v35 }
  0x68   : > { %v1979_v47 = vpop.eup %1978  ;;  %1708 = vst [vmem:[%s2636_s11 + $0x28] sm:$0xff] %v1644_v38  ;;  %v1581_v48 = vmul.f32 %v1977_v42, %v2602_v36  ;;  %v944_v49 = vmul.f32 1.442695, %v872_v39  ;;  %v1462_v50 = vmul.f32 1.442695, %v1390_v40  ;;  %v744_v51 = vadd.f32 %v2588_v20, %v678_v41  ;;  %v161_v38 = vld [vmem:[%s2547_s30 + $0x60] sm:$0xff] }
  0x69   : > { %v1127_v52 = vadd.f32 %v1063_v43, %v609_v29  ;;  %v610_v53 = vmul.f32 %v1979_v47, %v2572_v11  ;;  %1984 = vpow2.f32 %v490_v44  ;;  %v355_v9 = vmul.f32 %v290_v45, %v290_v45 }
  0x6a   : > { %1986 = vpow2.f32 %v944_v49  ;;  %v809_v54 = vmul.f32 %v744_v51, %v744_v51  ;;  %v1196_v55 = vmul.f32 %v2595_v28, %v158_v8  ;;  %v225_v56 = vmul.f32 %v2554_v1, %v159_v46 }
  0x6b   : > { %v1981_v58 = vpop.eup %1980  ;;  %v1645_v59 = vadd.f32 %v1581_v48, %v1127_v52  ;;  %1988 = vpow2.f32 %v1462_v50  ;;  %v419_v60 = vsub.f32 0.0, %v355_v9  ;;  %v679_v61 = vmul.f32 %v2583_v16, %v159_v46  ;;  %v162_v9 = vld [vmem:[%s2547_s30 + $0x68] sm:$0xff] }
  0x6c   : > { %v1064_v62 = vmul.f32 %v1981_v58, %v2592_v24  ;;  %v873_v14 = vsub.f32 0.0, %v809_v54  ;;  %v1262_v63 = vadd.f32 %v2600_v33, %v1196_v55  ;;  %v291_v0 = vadd.f32 %v2559_v5, %v225_v56 }
  0x6d   : > { %v1983_v2 = vpop.eup %1982  ;;  %1709 = vst [vmem:[%s2636_s11 + $0x30] sm:$0xff] %v1645_v59  ;;  %v492_v3 = vmul.f32 1.442695, %v419_v60  ;;  %v745_v4 = vadd.f32 %v2588_v20, %v679_v61  ;;  %v1197_v6 = vmul.f32 %v2595_v28, %v159_v46  ;;  %v226_v7 = vmul.f32 %v2554_v1, %v160_v57 }
  0x6e   : > { %v1128_v12 = vadd.f32 %v1064_v62, %v610_v53  ;;  %v1582_v15 = vmul.f32 %v1983_v2, %v2602_v36  ;;  %v946_v17 = vmul.f32 1.442695, %v873_v14  ;;  %v1327_v18 = vmul.f32 %v1262_v63, %v1262_v63 }
  0x6f   : > { %v1985_v19 = vpop.eup %1984  ;;  %1990 = vpow2.f32 %v492_v3  ;;  %v356_v21 = vmul.f32 %v291_v0, %v291_v0  ;;  %v810_v22 = vmul.f32 %v745_v4, %v745_v4  ;;  %v1263_v8 = vadd.f32 %v2600_v33, %v1197_v6 }
  0x70   : > { %v1987_v10 = vpop.eup %1986  ;;  %v1646_v23 = vadd.f32 %v1582_v15, %v1128_v12  ;;  %v611_v25 = vmul.f32 %v1985_v19, %v2572_v11  ;;  %1992 = vpow2.f32 %v946_v17  ;;  %v1391_v13 = vsub.f32 0.0, %v1327_v18 }
  0x71   : > { %v1989_v26 = vpop.eup %1988  ;;  %v1065_v27 = vmul.f32 %v1987_v10, %v2592_v24  ;;  %v420_v29 = vsub.f32 0.0, %v356_v21  ;;  %v874_v30 = vsub.f32 0.0, %v810_v22  ;;  %v1328_v31 = vmul.f32 %v1263_v8, %v1263_v8 }
  0x72   : > { %1710 = vst [vmem:[%s2636_s11 + $0x38] sm:$0xff] %v1646_v23  ;;  %v1583_v32 = vmul.f32 %v1989_v26, %v2602_v36  ;;  %v1464_v34 = vmul.f32 1.442695, %v1391_v13  ;;  %v292_v35 = vadd.f32 %v2559_v5, %v226_v7  ;;  %v680_v37 = vmul.f32 %v2583_v16, %v160_v57 }
  0x73   : > { %v1129_v39 = vadd.f32 %v1065_v27, %v611_v25  ;;  %v494_v40 = vmul.f32 1.442695, %v420_v29  ;;  %v948_v41 = vmul.f32 1.442695, %v874_v30  ;;  %v1392_v42 = vsub.f32 0.0, %v1328_v31 }
  0x74   : > { %1994 = vpow2.f32 %v1464_v34  ;;  %v357_v43 = vmul.f32 %v292_v35, %v292_v35  ;;  %v746_v44 = vadd.f32 %v2588_v20, %v680_v37  ;;  %v1198_v45 = vmul.f32 %v2595_v28, %v160_v57  ;;  %v163_v35 = vld [vmem:[%s2547_s30 + $0x70] sm:$0xff] }
  0x75   : > { %v1991_v46 = vpop.eup %1990  ;;  %v1647_v47 = vadd.f32 %v1583_v32, %v1129_v39  ;;  %1996 = vpow2.f32 %v494_v40  ;;  %v1466_v48 = vmul.f32 1.442695, %v1392_v42  ;;  %v227_v49 = vmul.f32 %v2554_v1, %v161_v38 }
  0x76   : > { %v1993_v50 = vpop.eup %1992  ;;  %v612_v51 = vmul.f32 %v1991_v46, %v2572_v11  ;;  %1998 = vpow2.f32 %v948_v41  ;;  %v421_v52 = vsub.f32 0.0, %v357_v43  ;;  %v811_v53 = vmul.f32 %v746_v44, %v746_v44 }
  0x77   : > { %1711 = vst [vmem:[%s2636_s11 + $0x40] sm:$0xff] %v1647_v47  ;;  %v1066_v54 = vmul.f32 %v1993_v50, %v2592_v24  ;;  %2000 = vpow2.f32 %v1466_v48  ;;  %v1264_v55 = vadd.f32 %v2600_v33, %v1198_v45  ;;  %v293_v56 = vadd.f32 %v2559_v5, %v227_v49  ;;  %v164_v49 = vld [vmem:[%s2547_s30 + $0x78] sm:$0xff] }
  0x78   : > { %v496_v57 = vmul.f32 1.442695, %v421_v52  ;;  %v875_v58 = vsub.f32 0.0, %v811_v53  ;;  %v681_v59 = vmul.f32 %v2583_v16, %v161_v38  ;;  %v1199_v60 = vmul.f32 %v2595_v28, %v161_v38 }
  0x79   : > { %v1130_v61 = vadd.f32 %v1066_v54, %v612_v51  ;;  %v1329_v62 = vmul.f32 %v1264_v55, %v1264_v55  ;;  %v358_v14 = vmul.f32 %v293_v56, %v293_v56  ;;  %v228_v63 = vmul.f32 %v2554_v1, %v162_v9 }
  0x7a   : > { %v1995_v0 = vpop.eup %1994  ;;  %2002 = vpow2.f32 %v496_v57  ;;  %v950_v2 = vmul.f32 1.442695, %v875_v58  ;;  %v747_v3 = vadd.f32 %v2588_v20, %v681_v59  ;;  %v1265_v4 = vadd.f32 %v2600_v33, %v1199_v60 }
  0x7b   : > { %v1997_v6 = vpop.eup %1996  ;;  %v1584_v7 = vmul.f32 %v1995_v0, %v2602_v36  ;;  %v1393_v12 = vsub.f32 0.0, %v1329_v62  ;;  %v422_v15 = vsub.f32 0.0, %v358_v14  ;;  %v294_v17 = vadd.f32 %v2559_v5, %v228_v63 }
  0x7c   : > { %v1999_v18 = vpop.eup %1998  ;;  %v613_v19 = vmul.f32 %v1997_v6, %v2572_v11  ;;  %2004 = vpow2.f32 %v950_v2  ;;  %v812_v21 = vmul.f32 %v747_v3, %v747_v3  ;;  %v1330_v22 = vmul.f32 %v1265_v4, %v1265_v4 }
  0x7d   : > { %v2001_v8 = vpop.eup %2000  ;;  %v1648_v10 = vadd.f32 %v1584_v7, %v1130_v61  ;;  %v1067_v23 = vmul.f32 %v1999_v18, %v2592_v24  ;;  %v1468_v25 = vmul.f32 1.442695, %v1393_v12  ;;  %v498_v13 = vmul.f32 1.442695, %v422_v15 }
  0x7e   : > { %v1585_v26 = vmul.f32 %v2001_v8, %v2602_v36  ;;  %v876_v27 = vsub.f32 0.0, %v812_v21  ;;  %v1394_v29 = vsub.f32 0.0, %v1330_v22  ;;  %v359_v30 = vmul.f32 %v294_v17, %v294_v17  ;;  %v165_v8 = vld [vmem:[%s2547_s30 + $0x80] sm:$0xff] }
  0x7f   : > { %1712 = vst [vmem:[%s2636_s11 + $0x48] sm:$0xff] %v1648_v10  ;;  %v1131_v31 = vadd.f32 %v1067_v23, %v613_v19  ;;  %2006 = vpow2.f32 %v1468_v25  ;;  %v682_v32 = vmul.f32 %v2583_v16, %v162_v9  ;;  %v1200_v34 = vmul.f32 %v2595_v28, %v162_v9 }
  0x80   : > { %v2003_v37 = vpop.eup %2002  ;;  %2008 = vpow2.f32 %v498_v13  ;;  %v952_v38 = vmul.f32 1.442695, %v876_v27  ;;  %v1470_v39 = vmul.f32 1.442695, %v1394_v29  ;;  %v423_v40 = vsub.f32 0.0, %v359_v30 }
  0x81   : > { %v1649_v41 = vadd.f32 %v1585_v26, %v1131_v31  ;;  %v614_v42 = vmul.f32 %v2003_v37, %v2572_v11  ;;  %v748_v43 = vadd.f32 %v2588_v20, %v682_v32  ;;  %v1266_v44 = vadd.f32 %v2600_v33, %v1200_v34 }
  0x82   : > { %v2005_v45 = vpop.eup %2004  ;;  %2010 = vpow2.f32 %v952_v38  ;;  %v500_v46 = vmul.f32 1.442695, %v423_v40  ;;  %v229_v47 = vmul.f32 %v2554_v1, %v163_v35  ;;  %v683_v48 = vmul.f32 %v2583_v16, %v163_v35 }
  0x83   : > { %1713 = vst [vmem:[%s2636_s11 + $0x50] sm:$0xff] %v1649_v41  ;;  %v1068_v50 = vmul.f32 %v2005_v45, %v2592_v24  ;;  %2012 = vpow2.f32 %v1470_v39  ;;  %v813_v51 = vmul.f32 %v748_v43, %v748_v43  ;;  %v1331_v52 = vmul.f32 %v1266_v44, %v1266_v44 }
  0x84   : > { %2014 = vpow2.f32 %v500_v46  ;;  %v295_v53 = vadd.f32 %v2559_v5, %v229_v47  ;;  %v749_v9 = vadd.f32 %v2588_v20, %v683_v48  ;;  %v1201_v54 = vmul.f32 %v2595_v28, %v163_v35  ;;  %v166_v35 = vld [vmem:[%s2547_s30 + $0x88] sm:$0xff] }
  0x85   : > { %v2007_v55 = vpop.eup %2006  ;;  %v1132_v56 = vadd.f32 %v1068_v50, %v614_v42  ;;  %v877_v57 = vsub.f32 0.0, %v813_v51  ;;  %v1395_v58 = vsub.f32 0.0, %v1331_v52  ;;  %v230_v59 = vmul.f32 %v2554_v1, %v164_v49 }
  0x86   : > { %v2009_v60 = vpop.eup %2008  ;;  %v1586_v61 = vmul.f32 %v2007_v55, %v2602_v36  ;;  %v360_v62 = vmul.f32 %v295_v53, %v295_v53  ;;  %v814_v14 = vmul.f32 %v749_v9, %v749_v9  ;;  %v1267_v63 = vadd.f32 %v2600_v33, %v1201_v54 }
  0x87   : > { %v615_v0 = vmul.f32 %v2009_v60, %v2572_v11  ;;  %v954_v2 = vmul.f32 1.442695, %v877_v57  ;;  %v1472_v3 = vmul.f32 1.442695, %v1395_v58  ;;  %v296_v4 = vadd.f32 %v2559_v5, %v230_v59 }
  0x88   : > { %v2011_v6 = vpop.eup %2010  ;;  %v1650_v7 = vadd.f32 %v1586_v61, %v1132_v56  ;;  %v424_v12 = vsub.f32 0.0, %v360_v62  ;;  %v878_v15 = vsub.f32 0.0, %v814_v14  ;;  %v1332_v17 = vmul.f32 %v1267_v63, %v1267_v63 }
  0x89   : > { %v2013_v18 = vpop.eup %2012  ;;  %v1069_v19 = vmul.f32 %v2011_v6, %v2592_v24  ;;  %2016 = vpow2.f32 %v954_v2  ;;  %v361_v21 = vmul.f32 %v296_v4, %v296_v4  ;;  %v684_v22 = vmul.f32 %v2583_v16, %v164_v49 }
  0x8a   : > { %v2015_v10 = vpop.eup %2014  ;;  %1714 = vst [vmem:[%s2636_s11 + $0x58] sm:$0xff] %v1650_v7  ;;  %v1587_v23 = vmul.f32 %v2013_v18, %v2602_v36  ;;  %2018 = vpow2.f32 %v1472_v3  ;;  %v502_v25 = vmul.f32 1.442695, %v424_v12  ;;  %v956_v13 = vmul.f32 1.442695, %v878_v15 }
  0x8b   : > { %v1133_v26 = vadd.f32 %v1069_v19, %v615_v0  ;;  %v616_v27 = vmul.f32 %v2015_v10, %v2572_v11  ;;  %v1396_v29 = vsub.f32 0.0, %v1332_v17  ;;  %v425_v30 = vsub.f32 0.0, %v361_v21 }
  0x8c   : > { %2020 = vpow2.f32 %v502_v25  ;;  %v750_v31 = vadd.f32 %v2588_v20, %v684_v22  ;;  %v1202_v32 = vmul.f32 %v2595_v28, %v164_v49  ;;  %v231_v34 = vmul.f32 %v2554_v1, %v165_v8  ;;  %v167_v22 = vld [vmem:[%s2547_s30 + $0x90] sm:$0xff] }
  0x8d   : > { %v1651_v37 = vadd.f32 %v1587_v23, %v1133_v26  ;;  %2022 = vpow2.f32 %v956_v13  ;;  %v1474_v38 = vmul.f32 1.442695, %v1396_v29  ;;  %v504_v39 = vmul.f32 1.442695, %v425_v30 }
  0x8e   : > { %v815_v40 = vmul.f32 %v750_v31, %v750_v31  ;;  %v1268_v41 = vadd.f32 %v2600_v33, %v1202_v32  ;;  %v297_v42 = vadd.f32 %v2559_v5, %v231_v34  ;;  %v685_v43 = vmul.f32 %v2583_v16, %v165_v8  ;;  %v168_v32 = vld [vmem:[%s2547_s30 + $0x98] sm:$0xff] }
  0x8f   : > { %v2017_v44 = vpop.eup %2016  ;;  %1715 = vst [vmem:[%s2636_s11 + $0x60] sm:$0xff] %v1651_v37  ;;  %2024 = vpow2.f32 %v1474_v38  ;;  %v1203_v45 = vmul.f32 %v2595_v28, %v165_v8  ;;  %v232_v46 = vmul.f32 %v2554_v1, %v166_v35  ;;  %v686_v47 = vmul.f32 %v2583_v16, %v166_v35 }
  0x90   : > { %v2019_v48 = vpop.eup %2018  ;;  %v1070_v49 = vmul.f32 %v2017_v44, %v2592_v24  ;;  %2026 = vpow2.f32 %v504_v39  ;;  %v879_v50 = vsub.f32 0.0, %v815_v40  ;;  %v1333_v51 = vmul.f32 %v1268_v41, %v1268_v41 }
  0x91   : > { %v1588_v52 = vmul.f32 %v2019_v48, %v2602_v36  ;;  %v362_v53 = vmul.f32 %v297_v42, %v297_v42  ;;  %v751_v9 = vadd.f32 %v2588_v20, %v685_v43  ;;  %v1269_v54 = vadd.f32 %v2600_v33, %v1203_v45 }
  0x92   : > { %v2021_v55 = vpop.eup %2020  ;;  %v1134_v56 = vadd.f32 %v1070_v49, %v616_v27  ;;  %v958_v57 = vmul.f32 1.442695, %v879_v50  ;;  %v1397_v58 = vsub.f32 0.0, %v1333_v51  ;;  %v298_v59 = vadd.f32 %v2559_v5, %v232_v46 }
  0x93   : > { %v2023_v60 = vpop.eup %2022  ;;  %v617_v61 = vmul.f32 %v2021_v55, %v2572_v11  ;;  %v426_v62 = vsub.f32 0.0, %v362_v53  ;;  %v816_v14 = vmul.f32 %v751_v9, %v751_v9  ;;  %v1334_v63 = vmul.f32 %v1269_v54, %v1269_v54 }
  0x94   : > { %v1652_v0 = vadd.f32 %v1588_v52, %v1134_v56  ;;  %v1071_v2 = vmul.f32 %v2023_v60, %v2592_v24  ;;  %2028 = vpow2.f32 %v958_v57  ;;  %v1476_v3 = vmul.f32 1.442695, %v1397_v58 }
  0x95   : > { %v2025_v4 = vpop.eup %2024  ;;  %v506_v6 = vmul.f32 1.442695, %v426_v62  ;;  %v880_v7 = vsub.f32 0.0, %v816_v14  ;;  %v1398_v12 = vsub.f32 0.0, %v1334_v63  ;;  %v363_v15 = vmul.f32 %v298_v59, %v298_v59 }
  0x96   : > { %v2027_v17 = vpop.eup %2026  ;;  %1716 = vst [vmem:[%s2636_s11 + $0x68] sm:$0xff] %v1652_v0  ;;  %v1135_v18 = vadd.f32 %v1071_v2, %v617_v61  ;;  %v1589_v19 = vmul.f32 %v2025_v4, %v2602_v36  ;;  %2030 = vpow2.f32 %v1476_v3  ;;  %v752_v21 = vadd.f32 %v2588_v20, %v686_v47  ;;  %v169_v4 = vld [vmem:[%s2547_s30 + $0xa0] sm:$0xff] }
  0x97   : > { %v618_v8 = vmul.f32 %v2027_v17, %v2572_v11  ;;  %2032 = vpow2.f32 %v506_v6  ;;  %v960_v10 = vmul.f32 1.442695, %v880_v7  ;;  %v1478_v23 = vmul.f32 1.442695, %v1398_v12 }
  0x98   : > { %v1653_v25 = vadd.f32 %v1589_v19, %v1135_v18  ;;  %v427_v13 = vsub.f32 0.0, %v363_v15  ;;  %v817_v26 = vmul.f32 %v752_v21, %v752_v21  ;;  %v1204_v27 = vmul.f32 %v2595_v28, %v166_v35 }
  0x99   : > { %2034 = vpow2.f32 %v960_v10  ;;  %v233_v29 = vmul.f32 %v2554_v1, %v167_v22  ;;  %v687_v30 = vmul.f32 %v2583_v16, %v167_v22  ;;  %v1205_v31 = vmul.f32 %v2595_v28, %v167_v22 }
  0x9a   : > { %v2029_v34 = vpop.eup %2028  ;;  %1717 = vst [vmem:[%s2636_s11 + $0x70] sm:$0xff] %v1653_v25  ;;  %2036 = vpow2.f32 %v1478_v23  ;;  %v508_v37 = vmul.f32 1.442695, %v427_v13  ;;  %v881_v38 = vsub.f32 0.0, %v817_v26  ;;  %v1270_v39 = vadd.f32 %v2600_v33, %v1204_v27  ;;  %v170_v23 = vld [vmem:[%s2547_s30 + $0xa8] sm:$0xff] }
  0x9b   : > { %v1072_v40 = vmul.f32 %v2029_v34, %v2592_v24  ;;  %v299_v41 = vadd.f32 %v2559_v5, %v233_v29  ;;  %v753_v35 = vadd.f32 %v2588_v20, %v687_v30  ;;  %v1271_v42 = vadd.f32 %v2600_v33, %v1205_v31 }
  0x9c   : > { %v2031_v43 = vpop.eup %2030  ;;  %2038 = vpow2.f32 %v508_v37  ;;  %v962_v44 = vmul.f32 1.442695, %v881_v38  ;;  %v1335_v45 = vmul.f32 %v1270_v39, %v1270_v39  ;;  %v234_v46 = vmul.f32 %v2554_v1, %v168_v32 }
  0x9d   : > { %v2033_v47 = vpop.eup %2032  ;;  %v1136_v48 = vadd.f32 %v1072_v40, %v618_v8  ;;  %v1590_v49 = vmul.f32 %v2031_v43, %v2602_v36  ;;  %v364_v50 = vmul.f32 %v299_v41, %v299_v41  ;;  %v818_v51 = vmul.f32 %v753_v35, %v753_v35 }
  0x9e   : > { %v619_v52 = vmul.f32 %v2033_v47, %v2572_v11  ;;  %2040 = vpow2.f32 %v962_v44  ;;  %v1399_v53 = vsub.f32 0.0, %v1335_v45  ;;  %v1336_v9 = vmul.f32 %v1271_v42, %v1271_v42 }
  0x9f   : > { %v2035_v54 = vpop.eup %2034  ;;  %v1654_v55 = vadd.f32 %v1590_v49, %v1136_v48  ;;  %v428_v56 = vsub.f32 0.0, %v364_v50  ;;  %v882_v57 = vsub.f32 0.0, %v818_v51  ;;  %v300_v58 = vadd.f32 %v2559_v5, %v234_v46 }
  0xa0   : > { %v2037_v59 = vpop.eup %2036  ;;  %v1073_v60 = vmul.f32 %v2035_v54, %v2592_v24  ;;  %v1480_v61 = vmul.f32 1.442695, %v1399_v53  ;;  %v1400_v62 = vsub.f32 0.0, %v1336_v9  ;;  %v688_v14 = vmul.f32 %v2583_v16, %v168_v32 }
  0xa1   : > { %1718 = vst [vmem:[%s2636_s11 + $0x78] sm:$0xff] %v1654_v55  ;;  %v1591_v63 = vmul.f32 %v2037_v59, %v2602_v36  ;;  %v510_v0 = vmul.f32 1.442695, %v428_v56  ;;  %v964_v2 = vmul.f32 1.442695, %v882_v57  ;;  %v365_v3 = vmul.f32 %v300_v58, %v300_v58 }
  0xa2   : > { %v2039_v6 = vpop.eup %2038  ;;  %v1137_v7 = vadd.f32 %v1073_v60, %v619_v52  ;;  %2042 = vpow2.f32 %v1480_v61  ;;  %v1482_v12 = vmul.f32 1.442695, %v1400_v62  ;;  %v754_v15 = vadd.f32 %v2588_v20, %v688_v14  ;;  %v171_v14 = vld [vmem:[%s2547_s30 + $0xb0] sm:$0xff] }
  0xa3   : > { %v620_v17 = vmul.f32 %v2039_v6, %v2572_v11  ;;  %2044 = vpow2.f32 %v510_v0  ;;  %v429_v18 = vsub.f32 0.0, %v365_v3  ;;  %v1206_v19 = vmul.f32 %v2595_v28, %v168_v32 }
  0xa4   : > { %v2041_v21 = vpop.eup %2040  ;;  %v1655_v22 = vadd.f32 %v1591_v63, %v1137_v7  ;;  %2046 = vpow2.f32 %v964_v2  ;;  %v819_v8 = vmul.f32 %v754_v15, %v754_v15  ;;  %v235_v10 = vmul.f32 %v2554_v1, %v169_v4 }
  0xa5   : > { %v1074_v25 = vmul.f32 %v2041_v21, %v2592_v24  ;;  %2048 = vpow2.f32 %v1482_v12  ;;  %v512_v13 = vmul.f32 1.442695, %v429_v18  ;;  %v1272_v26 = vadd.f32 %v2600_v33, %v1206_v19  ;;  %v172_v19 = vld [vmem:[%s2547_s30 + $0xb8] sm:$0xff] }
  0xa6   : > { %1719 = vst [vmem:[%s2636_s11 + $0x80] sm:$0xff] %v1655_v22  ;;  %v883_v27 = vsub.f32 0.0, %v819_v8  ;;  %v301_v29 = vadd.f32 %v2559_v5, %v235_v10  ;;  %v689_v30 = vmul.f32 %v2583_v16, %v169_v4  ;;  %v1207_v31 = vmul.f32 %v2595_v28, %v169_v4 }
  0xa7   : > { %v1138_v32 = vadd.f32 %v1074_v25, %v620_v17  ;;  %2050 = vpow2.f32 %v512_v13  ;;  %v1337_v34 = vmul.f32 %v1272_v26, %v1272_v26  ;;  %v236_v37 = vmul.f32 %v2554_v1, %v170_v23 }
  0xa8   : > { %v2043_v38 = vpop.eup %2042  ;;  %v966_v39 = vmul.f32 1.442695, %v883_v27  ;;  %v366_v40 = vmul.f32 %v301_v29, %v301_v29  ;;  %v755_v41 = vadd.f32 %v2588_v20, %v689_v30  ;;  %v1273_v35 = vadd.f32 %v2600_v33, %v1207_v31 }
  0xa9   : > { %v2045_v42 = vpop.eup %2044  ;;  %v1592_v43 = vmul.f32 %v2043_v38, %v2602_v36  ;;  %v1401_v44 = vsub.f32 0.0, %v1337_v34  ;;  %v302_v45 = vadd.f32 %v2559_v5, %v236_v37  ;;  %v690_v46 = vmul.f32 %v2583_v16, %v170_v23 }
  0xaa   : > { %v2047_v47 = vpop.eup %2046  ;;  %v621_v48 = vmul.f32 %v2045_v42, %v2572_v11  ;;  %2052 = vpow2.f32 %v966_v39  ;;  %v430_v49 = vsub.f32 0.0, %v366_v40  ;;  %v820_v50 = vmul.f32 %v755_v41, %v755_v41 }
  0xab   : > { %v2049_v51 = vpop.eup %2048  ;;  %v1656_v52 = vadd.f32 %v1592_v43, %v1138_v32  ;;  %v1075_v53 = vmul.f32 %v2047_v47, %v2592_v24  ;;  %v1484_v9 = vmul.f32 1.442695, %v1401_v44  ;;  %v1338_v54 = vmul.f32 %v1273_v35, %v1273_v35 }
  0xac   : > { %v1593_v55 = vmul.f32 %v2049_v51, %v2602_v36  ;;  %v514_v56 = vmul.f32 1.442695, %v430_v49  ;;  %v884_v57 = vsub.f32 0.0, %v820_v50  ;;  %v367_v58 = vmul.f32 %v302_v45, %v302_v45  ;;  %v173_v51 = vld [vmem:[%s2547_s30 + $0xc0] sm:$0xff] }
  0xad   : > { %v2051_v59 = vpop.eup %2050  ;;  %1720 = vst [vmem:[%s2636_s11 + $0x88] sm:$0xff] %v1656_v52  ;;  %v1139_v60 = vadd.f32 %v1075_v53, %v621_v48  ;;  %2054 = vpow2.f32 %v1484_v9  ;;  %v1402_v61 = vsub.f32 0.0, %v1338_v54  ;;  %v756_v62 = vadd.f32 %v2588_v20, %v690_v46 }
  0xae   : > { %v622_v63 = vmul.f32 %v2051_v59, %v2572_v11  ;;  %2056 = vpow2.f32 %v514_v56  ;;  %v968_v0 = vmul.f32 1.442695, %v884_v57  ;;  %v431_v2 = vsub.f32 0.0, %v367_v58 }
  0xaf   : > { %v1657_v3 = vadd.f32 %v1593_v55, %v1139_v60  ;;  %v1486_v4 = vmul.f32 1.442695, %v1402_v61  ;;  %v821_v6 = vmul.f32 %v756_v62, %v756_v62  ;;  %v1208_v7 = vmul.f32 %v2595_v28, %v170_v23 }
  0xb0   : > { %v2053_v12 = vpop.eup %2052  ;;  %2058 = vpow2.f32 %v968_v0  ;;  %v516_v15 = vmul.f32 1.442695, %v431_v2  ;;  %v237_v17 = vmul.f32 %v2554_v1, %v171_v14  ;;  %v691_v18 = vmul.f32 %v2583_v16, %v171_v14  ;;  %v174_v2 = vld [vmem:[%s2547_s30 + $0xc8] sm:$0xff] }
  0xb1   : > { %1721 = vst [vmem:[%s2636_s11 + $0x90] sm:$0xff] %v1657_v3  ;;  %v1076_v21 = vmul.f32 %v2053_v12, %v2592_v24  ;;  %2060 = vpow2.f32 %v1486_v4  ;;  %v885_v22 = vsub.f32 0.0, %v821_v6  ;;  %v1274_v8 = vadd.f32 %v2600_v33, %v1208_v7 }
  0xb2   : > { %2062 = vpow2.f32 %v516_v15  ;;  %v303_v10 = vadd.f32 %v2559_v5, %v237_v17  ;;  %v757_v23 = vadd.f32 %v2588_v20, %v691_v18  ;;  %v1209_v25 = vmul.f32 %v2595_v28, %v171_v14 }
  0xb3   : > { %v2055_v13 = vpop.eup %2054  ;;  %v1140_v26 = vadd.f32 %v1076_v21, %v622_v63  ;;  %v970_v27 = vmul.f32 1.442695, %v885_v22  ;;  %v1339_v29 = vmul.f32 %v1274_v8, %v1274_v8  ;;  %v238_v30 = vmul.f32 %v2554_v1, %v172_v19 }
  0xb4   : > { %v2057_v31 = vpop.eup %2056  ;;  %v1594_v32 = vmul.f32 %v2055_v13, %v2602_v36  ;;  %v368_v34 = vmul.f32 %v303_v10, %v303_v10  ;;  %v822_v37 = vmul.f32 %v757_v23, %v757_v23  ;;  %v1275_v38 = vadd.f32 %v2600_v33, %v1209_v25 }
  0xb5   : > { %v623_v39 = vmul.f32 %v2057_v31, %v2572_v11  ;;  %2064 = vpow2.f32 %v970_v27  ;;  %v1403_v40 = vsub.f32 0.0, %v1339_v29  ;;  %v304_v41 = vadd.f32 %v2559_v5, %v238_v30 }
  0xb6   : > { %v2059_v35 = vpop.eup %2058  ;;  %v1658_v42 = vadd.f32 %v1594_v32, %v1140_v26  ;;  %v432_v43 = vsub.f32 0.0, %v368_v34  ;;  %v886_v44 = vsub.f32 0.0, %v822_v37  ;;  %v1340_v45 = vmul.f32 %v1275_v38, %v1275_v38 }
  0xb7   : > { %v2061_v46 = vpop.eup %2060  ;;  %v1077_v47 = vmul.f32 %v2059_v35, %v2592_v24  ;;  %v1488_v48 = vmul.f32 1.442695, %v1403_v40  ;;  %v369_v49 = vmul.f32 %v304_v41, %v304_v41  ;;  %v692_v50 = vmul.f32 %v2583_v16, %v172_v19 }
  0xb8   : > { %v2063_v52 = vpop.eup %2062  ;;  %1722 = vst [vmem:[%s2636_s11 + $0x98] sm:$0xff] %v1658_v42  ;;  %v1595_v53 = vmul.f32 %v2061_v46, %v2602_v36  ;;  %v518_v9 = vmul.f32 1.442695, %v432_v43  ;;  %v972_v54 = vmul.f32 1.442695, %v886_v44  ;;  %v1404_v55 = vsub.f32 0.0, %v1340_v45 }
  0xb9   : > { %v1141_v56 = vadd.f32 %v1077_v47, %v623_v39  ;;  %v624_v57 = vmul.f32 %v2063_v52, %v2572_v11  ;;  %2066 = vpow2.f32 %v1488_v48  ;;  %v433_v58 = vsub.f32 0.0, %v369_v49  ;;  %v175_v47 = vld [vmem:[%s2547_s30 + $0xd0] sm:$0xff] }
  0xba   : > { %2068 = vpow2.f32 %v518_v9  ;;  %v1490_v59 = vmul.f32 1.442695, %v1404_v55  ;;  %v758_v60 = vadd.f32 %v2588_v20, %v692_v50  ;;  %v1210_v61 = vmul.f32 %v2595_v28, %v172_v19 }
  0xbb   : > { %v2065_v62 = vpop.eup %2064  ;;  %v1659_v14 = vadd.f32 %v1595_v53, %v1141_v56  ;;  %2070 = vpow2.f32 %v972_v54  ;;  %v520_v63 = vmul.f32 1.442695, %v433_v58  ;;  %v239_v0 = vmul.f32 %v2554_v1, %v173_v51 }
  0xbc   : > { %v1078_v3 = vmul.f32 %v2065_v62, %v2592_v24  ;;  %2072 = vpow2.f32 %v1490_v59  ;;  %v823_v4 = vmul.f32 %v758_v60, %v758_v60  ;;  %v1276_v6 = vadd.f32 %v2600_v33, %v1210_v61  ;;  %v176_v60 = vld [vmem:[%s2547_s30 + $0xd8] sm:$0xff] }
  0xbd   : > { %1723 = vst [vmem:[%s2636_s11 + $0xa0] sm:$0xff] %v1659_v14  ;;  %2074 = vpow2.f32 %v520_v63  ;;  %v305_v7 = vadd.f32 %v2559_v5, %v239_v0  ;;  %v693_v12 = vmul.f32 %v2583_v16, %v173_v51  ;;  %v1211_v15 = vmul.f32 %v2595_v28, %v173_v51 }
  0xbe   : > { %v1142_v17 = vadd.f32 %v1078_v3, %v624_v57  ;;  %v887_v18 = vsub.f32 0.0, %v823_v4  ;;  %v1341_v19 = vmul.f32 %v1276_v6, %v1276_v6  ;;  %v240_v21 = vmul.f32 %v2554_v1, %v174_v2 }
  0xbf   : > { %v2067_v22 = vpop.eup %2066  ;;  %v370_v8 = vmul.f32 %v305_v7, %v305_v7  ;;  %v759_v10 = vadd.f32 %v2588_v20, %v693_v12  ;;  %v1277_v23 = vadd.f32 %v2600_v33, %v1211_v15  ;;  %v694_v25 = vmul.f32 %v2583_v16, %v174_v2 }
  0xc0   : > { %v2069_v13 = vpop.eup %2068  ;;  %v1596_v26 = vmul.f32 %v2067_v22, %v2602_v36  ;;  %v974_v27 = vmul.f32 1.442695, %v887_v18  ;;  %v1405_v29 = vsub.f32 0.0, %v1341_v19  ;;  %v306_v30 = vadd.f32 %v2559_v5, %v240_v21 }
  0xc1   : > { %v2071_v31 = vpop.eup %2070  ;;  %v625_v32 = vmul.f32 %v2069_v13, %v2572_v11  ;;  %v434_v34 = vsub.f32 0.0, %v370_v8  ;;  %v824_v37 = vmul.f32 %v759_v10, %v759_v10  ;;  %v1342_v38 = vmul.f32 %v1277_v23, %v1277_v23 }
  0xc2   : > { %v2073_v39 = vpop.eup %2072  ;;  %v1660_v40 = vadd.f32 %v1596_v26, %v1142_v17  ;;  %v1079_v41 = vmul.f32 %v2071_v31, %v2592_v24  ;;  %2076 = vpow2.f32 %v974_v27  ;;  %v1492_v35 = vmul.f32 1.442695, %v1405_v29 }
  0xc3   : > { %v2075_v42 = vpop.eup %2074  ;;  %v1597_v43 = vmul.f32 %v2073_v39, %v2602_v36  ;;  %v522_v44 = vmul.f32 1.442695, %v434_v34  ;;  %v888_v45 = vsub.f32 0.0, %v824_v37  ;;  %v1406_v46 = vsub.f32 0.0, %v1342_v38 }
  0xc4   : > { %1724 = vst [vmem:[%s2636_s11 + $0xa8] sm:$0xff] %v1660_v40  ;;  %v1143_v48 = vadd.f32 %v1079_v41, %v625_v32  ;;  %v626_v49 = vmul.f32 %v2075_v42, %v2572_v11  ;;  %2078 = vpow2.f32 %v1492_v35  ;;  %v371_v50 = vmul.f32 %v306_v30, %v306_v30  ;;  %v177_v35 = vld [vmem:[%s2547_s30 + $0xe0] sm:$0xff] }
  0xc5   : > { %2080 = vpow2.f32 %v522_v44  ;;  %v976_v51 = vmul.f32 1.442695, %v888_v45  ;;  %v1494_v52 = vmul.f32 1.442695, %v1406_v46  ;;  %v760_v53 = vadd.f32 %v2588_v20, %v694_v25 }
  0xc6   : > { %v1661_v9 = vadd.f32 %v1597_v43, %v1143_v48  ;;  %v435_v54 = vsub.f32 0.0, %v371_v50  ;;  %v1212_v55 = vmul.f32 %v2595_v28, %v174_v2  ;;  %v241_v56 = vmul.f32 %v2554_v1, %v175_v47 }
  0xc7   : > { %2082 = vpow2.f32 %v976_v51  ;;  %v825_v57 = vmul.f32 %v760_v53, %v760_v53  ;;  %v695_v58 = vmul.f32 %v2583_v16, %v175_v47  ;;  %v1213_v59 = vmul.f32 %v2595_v28, %v175_v47 }
  0xc8   : > { %v2077_v61 = vpop.eup %2076  ;;  %1725 = vst [vmem:[%s2636_s11 + $0xb0] sm:$0xff] %v1661_v9  ;;  %2084 = vpow2.f32 %v1494_v52  ;;  %v524_v62 = vmul.f32 1.442695, %v435_v54  ;;  %v1278_v14 = vadd.f32 %v2600_v33, %v1212_v55  ;;  %v307_v63 = vadd.f32 %v2559_v5, %v241_v56  ;;  %v178_v52 = vld [vmem:[%s2547_s30 + $0xe8] sm:$0xff] }
  0xc9   : > { %v1080_v0 = vmul.f32 %v2077_v61, %v2592_v24  ;;  %v889_v2 = vsub.f32 0.0, %v825_v57  ;;  %v761_v3 = vadd.f32 %v2588_v20, %v695_v58  ;;  %v1279_v4 = vadd.f32 %v2600_v33, %v1213_v59 }
  0xca   : > { %v2079_v6 = vpop.eup %2078  ;;  %2086 = vpow2.f32 %v524_v62  ;;  %v1343_v7 = vmul.f32 %v1278_v14, %v1278_v14  ;;  %v372_v12 = vmul.f32 %v307_v63, %v307_v63  ;;  %v242_v15 = vmul.f32 %v2554_v1, %v176_v60 }
  0xcb   : > { %v2081_v17 = vpop.eup %2080  ;;  %v1144_v18 = vadd.f32 %v1080_v0, %v626_v49  ;;  %v1598_v19 = vmul.f32 %v2079_v6, %v2602_v36  ;;  %v978_v21 = vmul.f32 1.442695, %v889_v2  ;;  %v826_v22 = vmul.f32 %v761_v3, %v761_v3 }
  0xcc   : > { %v627_v8 = vmul.f32 %v2081_v17, %v2572_v11  ;;  %v1407_v10 = vsub.f32 0.0, %v1343_v7  ;;  %v436_v23 = vsub.f32 0.0, %v372_v12  ;;  %v1344_v25 = vmul.f32 %v1279_v4, %v1279_v4 }
  0xcd   : > { %v2083_v13 = vpop.eup %2082  ;;  %v1662_v26 = vadd.f32 %v1598_v19, %v1144_v18  ;;  %2088 = vpow2.f32 %v978_v21  ;;  %v890_v27 = vsub.f32 0.0, %v826_v22  ;;  %v308_v29 = vadd.f32 %v2559_v5, %v242_v15 }
  0xce   : > { %v2085_v30 = vpop.eup %2084  ;;  %v1081_v31 = vmul.f32 %v2083_v13, %v2592_v24  ;;  %v1496_v32 = vmul.f32 1.442695, %v1407_v10  ;;  %v526_v34 = vmul.f32 1.442695, %v436_v23  ;;  %v1408_v37 = vsub.f32 0.0, %v1344_v25 }
  0xcf   : > { %1726 = vst [vmem:[%s2636_s11 + $0xb8] sm:$0xff] %v1662_v26  ;;  %v1599_v38 = vmul.f32 %v2085_v30, %v2602_v36  ;;  %v980_v39 = vmul.f32 1.442695, %v890_v27  ;;  %v373_v40 = vmul.f32 %v308_v29, %v308_v29  ;;  %v696_v41 = vmul.f32 %v2583_v16, %v176_v60 }
  0xd0   : > { %v2087_v42 = vpop.eup %2086  ;;  %v1145_v43 = vadd.f32 %v1081_v31, %v627_v8  ;;  %2090 = vpow2.f32 %v1496_v32  ;;  %v1498_v44 = vmul.f32 1.442695, %v1408_v37  ;;  %v1214_v45 = vmul.f32 %v2595_v28, %v176_v60  ;;  %v179_v37 = vld [vmem:[%s2547_s30 + $0xf0] sm:$0xff] }
  0xd1   : > { %v628_v46 = vmul.f32 %v2087_v42, %v2572_v11  ;;  %2092 = vpow2.f32 %v526_v34  ;;  %v437_v47 = vsub.f32 0.0, %v373_v40  ;;  %v762_v48 = vadd.f32 %v2588_v20, %v696_v41  ;;  %v180_v41 = vld [vmem:[%s2547_s30 + $0xf8] sm:$0xff] }
  0xd2   : > { %v1663_v49 = vadd.f32 %v1599_v38, %v1145_v43  ;;  %2094 = vpow2.f32 %v980_v39  ;;  %v1280_v50 = vadd.f32 %v2600_v33, %v1214_v45  ;;  %v243_v51 = vmul.f32 %v2554_v1, %v177_v35 }
  0xd3   : > { %v2089_v53 = vpop.eup %2088  ;;  %2096 = vpow2.f32 %v1498_v44  ;;  %v528_v9 = vmul.f32 1.442695, %v437_v47  ;;  %v827_v54 = vmul.f32 %v762_v48, %v762_v48  ;;  %v697_v55 = vmul.f32 %v2583_v16, %v177_v35 }
  0xd4   : > { %1727 = vst [vmem:[%s2636_s11 + $0xc0] sm:$0xff] %v1663_v49  ;;  %v1082_v56 = vmul.f32 %v2089_v53, %v2592_v24  ;;  %v1345_v57 = vmul.f32 %v1280_v50, %v1280_v50  ;;  %v309_v58 = vadd.f32 %v2559_v5, %v243_v51  ;;  %v1215_v59 = vmul.f32 %v2595_v28, %v177_v35 }
  0xd5   : > { %2098 = vpow2.f32 %v528_v9  ;;  %v891_v60 = vsub.f32 0.0, %v827_v54  ;;  %v763_v61 = vadd.f32 %v2588_v20, %v697_v55  ;;  %v244_v62 = vmul.f32 %v2554_v1, %v178_v52 }
  0xd6   : > { %v2091_v14 = vpop.eup %2090  ;;  %v1146_v63 = vadd.f32 %v1082_v56, %v628_v46  ;;  %v1409_v0 = vsub.f32 0.0, %v1345_v57  ;;  %v374_v2 = vmul.f32 %v309_v58, %v309_v58  ;;  %v1281_v3 = vadd.f32 %v2600_v33, %v1215_v59 }
  0xd7   : > { %v2093_v4 = vpop.eup %2092  ;;  %v1600_v6 = vmul.f32 %v2091_v14, %v2602_v36  ;;  %v982_v7 = vmul.f32 1.442695, %v891_v60  ;;  %v828_v12 = vmul.f32 %v763_v61, %v763_v61  ;;  %v310_v15 = vadd.f32 %v2559_v5, %v244_v62 }
  0xd8   : > { %v2095_v17 = vpop.eup %2094  ;;  %v629_v18 = vmul.f32 %v2093_v4, %v2572_v11  ;;  %v1500_v19 = vmul.f32 1.442695, %v1409_v0  ;;  %v438_v21 = vsub.f32 0.0, %v374_v2  ;;  %v1346_v22 = vmul.f32 %v1281_v3, %v1281_v3 }
  0xd9   : > { %v2097_v8 = vpop.eup %2096  ;;  %v1664_v10 = vadd.f32 %v1600_v6, %v1146_v63  ;;  %v1083_v23 = vmul.f32 %v2095_v17, %v2592_v24  ;;  %2100 = vpow2.f32 %v982_v7  ;;  %v892_v25 = vsub.f32 0.0, %v828_v12 }
  0xda   : > { %v1601_v13 = vmul.f32 %v2097_v8, %v2602_v36  ;;  %2102 = vpow2.f32 %v1500_v19  ;;  %v530_v26 = vmul.f32 1.442695, %v438_v21  ;;  %v1410_v27 = vsub.f32 0.0, %v1346_v22 }
  0xdb   : > { %v2099_v29 = vpop.eup %2098  ;;  %1728 = vst [vmem:[%s2636_s11 + $0xc8] sm:$0xff] %v1664_v10  ;;  %v1147_v30 = vadd.f32 %v1083_v23, %v629_v18  ;;  %v984_v31 = vmul.f32 1.442695, %v892_v25  ;;  %v375_v32 = vmul.f32 %v310_v15, %v310_v15  ;;  %v698_v34 = vmul.f32 %v2583_v16, %v178_v52  ;;  %v181_v23 = vld [vmem:[%s2547_s30 + $0x100] sm:$0xff] }
  0xdc   : > { %v630_v38 = vmul.f32 %v2099_v29, %v2572_v11  ;;  %2104 = vpow2.f32 %v530_v26  ;;  %v1502_v39 = vmul.f32 1.442695, %v1410_v27  ;;  %v1216_v40 = vmul.f32 %v2595_v28, %v178_v52 }
  0xdd   : > { %v1665_v35 = vadd.f32 %v1601_v13, %v1147_v30  ;;  %2106 = vpow2.f32 %v984_v31  ;;  %v439_v42 = vsub.f32 0.0, %v375_v32  ;;  %v764_v43 = vadd.f32 %v2588_v20, %v698_v34  ;;  %v182_v34 = vld [vmem:[%s2547_s30 + $0x108] sm:$0xff] }
  0xde   : > { %2108 = vpow2.f32 %v1502_v39  ;;  %v1282_v44 = vadd.f32 %v2600_v33, %v1216_v40  ;;  %v245_v45 = vmul.f32 %v2554_v1, %v179_v37  ;;  %v699_v46 = vmul.f32 %v2583_v16, %v179_v37 }
  0xdf   : > { %v2101_v47 = vpop.eup %2100  ;;  %1729 = vst [vmem:[%s2636_s11 + $0xd0] sm:$0xff] %v1665_v35  ;;  %v532_v48 = vmul.f32 1.442695, %v439_v42  ;;  %v829_v49 = vmul.f32 %v764_v43, %v764_v43  ;;  %v1217_v50 = vmul.f32 %v2595_v28, %v179_v37  ;;  %v246_v51 = vmul.f32 %v2554_v1, %v180_v41 }
  0xe0   : > { %v2103_v52 = vpop.eup %2102  ;;  %v1084_v53 = vmul.f32 %v2101_v47, %v2592_v24  ;;  %v1347_v9 = vmul.f32 %v1282_v44, %v1282_v44  ;;  %v311_v54 = vadd.f32 %v2559_v5, %v245_v45  ;;  %v765_v55 = vadd.f32 %v2588_v20, %v699_v46 }
  0xe1   : > { %v1602_v56 = vmul.f32 %v2103_v52, %v2602_v36  ;;  %2110 = vpow2.f32 %v532_v48  ;;  %v893_v57 = vsub.f32 0.0, %v829_v49  ;;  %v1283_v58 = vadd.f32 %v2600_v33, %v1217_v50 }
  0xe2   : > { %v2105_v59 = vpop.eup %2104  ;;  %v1148_v60 = vadd.f32 %v1084_v53, %v630_v38  ;;  %v1411_v61 = vsub.f32 0.0, %v1347_v9  ;;  %v376_v62 = vmul.f32 %v311_v54, %v311_v54  ;;  %v830_v14 = vmul.f32 %v765_v55, %v765_v55 }
  0xe3   : > { %v2107_v63 = vpop.eup %2106  ;;  %v631_v0 = vmul.f32 %v2105_v59, %v2572_v11  ;;  %v986_v2 = vmul.f32 1.442695, %v893_v57  ;;  %v1348_v3 = vmul.f32 %v1283_v58, %v1283_v58  ;;  %v312_v4 = vadd.f32 %v2559_v5, %v246_v51 }
  0xe4   : > { %v2109_v6 = vpop.eup %2108  ;;  %v1666_v7 = vadd.f32 %v1602_v56, %v1148_v60  ;;  %v1085_v12 = vmul.f32 %v2107_v63, %v2592_v24  ;;  %v1504_v15 = vmul.f32 1.442695, %v1411_v61  ;;  %v440_v17 = vsub.f32 0.0, %v376_v62 }
  0xe5   : > { %v1603_v18 = vmul.f32 %v2109_v6, %v2602_v36  ;;  %2112 = vpow2.f32 %v986_v2  ;;  %v894_v19 = vsub.f32 0.0, %v830_v14  ;;  %v1412_v21 = vsub.f32 0.0, %v1348_v3 }
  0xe6   : > { %1730 = vst [vmem:[%s2636_s11 + $0xd8] sm:$0xff] %v1666_v7  ;;  %v1149_v22 = vadd.f32 %v1085_v12, %v631_v0  ;;  %2114 = vpow2.f32 %v1504_v15  ;;  %v534_v8 = vmul.f32 1.442695, %v440_v17  ;;  %v377_v10 = vmul.f32 %v312_v4, %v312_v4  ;;  %v183_v15 = vld [vmem:[%s2547_s30 + $0x110] sm:$0xff] }
  0xe7   : > { %v2111_v25 = vpop.eup %2110  ;;  %v988_v13 = vmul.f32 1.442695, %v894_v19  ;;  %v1506_v26 = vmul.f32 1.442695, %v1412_v21  ;;  %v700_v27 = vmul.f32 %v2583_v16, %v180_v41  ;;  %v1218_v29 = vmul.f32 %v2595_v28, %v180_v41 }
  0xe8   : > { %v1667_v30 = vadd.f32 %v1603_v18, %v1149_v22  ;;  %v632_v31 = vmul.f32 %v2111_v25, %v2572_v11  ;;  %2116 = vpow2.f32 %v534_v8  ;;  %v441_v32 = vsub.f32 0.0, %v377_v10 }
  0xe9   : > { %2118 = vpow2.f32 %v988_v13  ;;  %v766_v37 = vadd.f32 %v2588_v20, %v700_v27  ;;  %v1284_v38 = vadd.f32 %v2600_v33, %v1218_v29  ;;  %v247_v39 = vmul.f32 %v2554_v1, %v181_v23 }
  0xea   : > { %1731 = vst [vmem:[%s2636_s11 + $0xe0] sm:$0xff] %v1667_v30  ;;  %2120 = vpow2.f32 %v1506_v26  ;;  %v536_v40 = vmul.f32 1.442695, %v441_v32  ;;  %v701_v35 = vmul.f32 %v2583_v16, %v181_v23  ;;  %v1219_v41 = vmul.f32 %v2595_v28, %v181_v23  ;;  %v184_v23 = vld [vmem:[%s2547_s30 + $0x118] sm:$0xff] }
  0xeb   : > { %v2113_v42 = vpop.eup %2112  ;;  %v831_v43 = vmul.f32 %v766_v37, %v766_v37  ;;  %v1349_v44 = vmul.f32 %v1284_v38, %v1284_v38  ;;  %v313_v45 = vadd.f32 %v2559_v5, %v247_v39  ;;  %v248_v46 = vmul.f32 %v2554_v1, %v182_v34 }
  0xec   : > { %v2115_v47 = vpop.eup %2114  ;;  %v1086_v48 = vmul.f32 %v2113_v42, %v2592_v24  ;;  %2122 = vpow2.f32 %v536_v40  ;;  %v767_v49 = vadd.f32 %v2588_v20, %v701_v35  ;;  %v1285_v50 = vadd.f32 %v2600_v33, %v1219_v41 }
  0xed   : > { %v1604_v51 = vmul.f32 %v2115_v47, %v2602_v36  ;;  %v895_v52 = vsub.f32 0.0, %v831_v43  ;;  %v1413_v53 = vsub.f32 0.0, %v1349_v44  ;;  %v378_v9 = vmul.f32 %v313_v45, %v313_v45 }
  0xee   : > { %v2117_v54 = vpop.eup %2116  ;;  %v1150_v55 = vadd.f32 %v1086_v48, %v632_v31  ;;  %v832_v56 = vmul.f32 %v767_v49, %v767_v49  ;;  %v1350_v57 = vmul.f32 %v1285_v50, %v1285_v50  ;;  %v314_v58 = vadd.f32 %v2559_v5, %v248_v46 }
  0xef   : > { %v2119_v59 = vpop.eup %2118  ;;  %v633_v60 = vmul.f32 %v2117_v54, %v2572_v11  ;;  %v990_v61 = vmul.f32 1.442695, %v895_v52  ;;  %v1508_v62 = vmul.f32 1.442695, %v1413_v53  ;;  %v442_v14 = vsub.f32 0.0, %v378_v9 }
  0xf0   : > { %v2121_v63 = vpop.eup %2120  ;;  %v1668_v0 = vadd.f32 %v1604_v51, %v1150_v55  ;;  %v1087_v2 = vmul.f32 %v2119_v59, %v2592_v24  ;;  %v896_v3 = vsub.f32 0.0, %v832_v56  ;;  %v1414_v4 = vsub.f32 0.0, %v1350_v57 }
  0xf1   : > { %v1605_v6 = vmul.f32 %v2121_v63, %v2602_v36  ;;  %2124 = vpow2.f32 %v990_v61  ;;  %v538_v7 = vmul.f32 1.442695, %v442_v14  ;;  %v379_v12 = vmul.f32 %v314_v58, %v314_v58 }
  0xf2   : > { %v2123_v17 = vpop.eup %2122  ;;  %1732 = vst [vmem:[%s2636_s11 + $0xe8] sm:$0xff] %v1668_v0  ;;  %v1151_v18 = vadd.f32 %v1087_v2, %v633_v60  ;;  %2126 = vpow2.f32 %v1508_v62  ;;  %v992_v19 = vmul.f32 1.442695, %v896_v3  ;;  %v1510_v21 = vmul.f32 1.442695, %v1414_v4  ;;  %v185_v4 = vld [vmem:[%s2547_s30 + $0x120] sm:$0xff] }
  0xf3   : > { %v634_v22 = vmul.f32 %v2123_v17, %v2572_v11  ;;  %2128 = vpow2.f32 %v538_v7  ;;  %v443_v8 = vsub.f32 0.0, %v379_v12  ;;  %v702_v10 = vmul.f32 %v2583_v16, %v182_v34 }
  0xf4   : > { %v1669_v25 = vadd.f32 %v1605_v6, %v1151_v18  ;;  %2130 = vpow2.f32 %v992_v19  ;;  %v1220_v13 = vmul.f32 %v2595_v28, %v182_v34  ;;  %v249_v26 = vmul.f32 %v2554_v1, %v183_v15  ;;  %v186_v19 = vld [vmem:[%s2547_s30 + $0x128] sm:$0xff] }
  0xf5   : > { %2132 = vpow2.f32 %v1510_v21  ;;  %v540_v27 = vmul.f32 1.442695, %v443_v8  ;;  %v768_v29 = vadd.f32 %v2588_v20, %v702_v10  ;;  %v703_v30 = vmul.f32 %v2583_v16, %v183_v15 }
  0xf6   : > { %1733 = vst [vmem:[%s2636_s11 + $0xf0] sm:$0xff] %v1669_v25  ;;  %v1286_v31 = vadd.f32 %v2600_v33, %v1220_v13  ;;  %v315_v32 = vadd.f32 %v2559_v5, %v249_v26  ;;  %v1221_v37 = vmul.f32 %v2595_v28, %v183_v15  ;;  %v250_v38 = vmul.f32 %v2554_v1, %v184_v23 }
  0xf7   : > { %v2125_v39 = vpop.eup %2124  ;;  %2134 = vpow2.f32 %v540_v27  ;;  %v833_v34 = vmul.f32 %v768_v29, %v768_v29  ;;  %v769_v40 = vadd.f32 %v2588_v20, %v703_v30  ;;  %v704_v35 = vmul.f32 %v2583_v16, %v184_v23 }
  0xf8   : > { %v2127_v41 = vpop.eup %2126  ;;  %v1088_v42 = vmul.f32 %v2125_v39, %v2592_v24  ;;  %v1351_v43 = vmul.f32 %v1286_v31, %v1286_v31  ;;  %v380_v44 = vmul.f32 %v315_v32, %v315_v32  ;;  %v1287_v45 = vadd.f32 %v2600_v33, %v1221_v37 }
  0xf9   : > { %v2129_v46 = vpop.eup %2128  ;;  %v1606_v47 = vmul.f32 %v2127_v41, %v2602_v36  ;;  %v897_v48 = vsub.f32 0.0, %v833_v34  ;;  %v834_v49 = vmul.f32 %v769_v40, %v769_v40  ;;  %v316_v50 = vadd.f32 %v2559_v5, %v250_v38 }
  0xfa   : > { %v2131_v51 = vpop.eup %2130  ;;  %v1152_v52 = vadd.f32 %v1088_v42, %v634_v22  ;;  %v635_v53 = vmul.f32 %v2129_v46, %v2572_v11  ;;  %v1415_v9 = vsub.f32 0.0, %v1351_v43  ;;  %v444_v54 = vsub.f32 0.0, %v380_v44 }
  0xfb   : > { %v2133_v55 = vpop.eup %2132  ;;  %v1089_v56 = vmul.f32 %v2131_v51, %v2592_v24  ;;  %v994_v57 = vmul.f32 1.442695, %v897_v48  ;;  %v898_v58 = vsub.f32 0.0, %v834_v49  ;;  %v1352_v59 = vmul.f32 %v1287_v45, %v1287_v45 }
  0xfc   : > { %v1670_v60 = vadd.f32 %v1606_v47, %v1152_v52  ;;  %v1607_v61 = vmul.f32 %v2133_v55, %v2602_v36  ;;  %v1512_v62 = vmul.f32 1.442695, %v1415_v9  ;;  %v542_v14 = vmul.f32 1.442695, %v444_v54 }
  0xfd   : > { %v2135_v63 = vpop.eup %2134  ;;  %v1153_v0 = vadd.f32 %v1089_v56, %v635_v53  ;;  %2136 = vpow2.f32 %v994_v57  ;;  %v996_v2 = vmul.f32 1.442695, %v898_v58  ;;  %v1416_v3 = vsub.f32 0.0, %v1352_v59  ;;  %v187_v58 = vld [vmem:[%s2547_s30 + $0x130] sm:$0xff] }
  0xfe   : > { %1734 = vst [vmem:[%s2636_s11 + $0xf8] sm:$0xff] %v1670_v60  ;;  %v636_v6 = vmul.f32 %v2135_v63, %v2572_v11  ;;  %2138 = vpow2.f32 %v1512_v62  ;;  %v381_v7 = vmul.f32 %v316_v50, %v316_v50  ;;  %v770_v12 = vadd.f32 %v2588_v20, %v704_v35 }
  0xff   : > { %v1671_v15 = vadd.f32 %v1607_v61, %v1153_v0  ;;  %2140 = vpow2.f32 %v542_v14  ;;  %v1514_v17 = vmul.f32 1.442695, %v1416_v3  ;;  %v1222_v18 = vmul.f32 %v2595_v28, %v184_v23 }
 0x100   : > { %2142 = vpow2.f32 %v996_v2  ;;  %v445_v21 = vsub.f32 0.0, %v381_v7  ;;  %v835_v22 = vmul.f32 %v770_v12, %v770_v12  ;;  %v251_v8 = vmul.f32 %v2554_v1, %v185_v4 }
 0x101   : > { %1735 = vst [vmem:[%s2636_s11 + $0x100] sm:$0xff] %v1671_v15  ;;  %2144 = vpow2.f32 %v1514_v17  ;;  %v1288_v10 = vadd.f32 %v2600_v33, %v1222_v18  ;;  %v705_v25 = vmul.f32 %v2583_v16, %v185_v4  ;;  %v1223_v13 = vmul.f32 %v2595_v28, %v185_v4 }
 0x102   : > { %v544_v26 = vmul.f32 1.442695, %v445_v21  ;;  %v899_v27 = vsub.f32 0.0, %v835_v22  ;;  %v317_v29 = vadd.f32 %v2559_v5, %v251_v8  ;;  %v252_v23 = vmul.f32 %v2554_v1, %v186_v19 }
 0x103   : > { %v2137_v30 = vpop.eup %2136  ;;  %v1353_v31 = vmul.f32 %v1288_v10, %v1288_v10  ;;  %v771_v32 = vadd.f32 %v2588_v20, %v705_v25  ;;  %v1289_v37 = vadd.f32 %v2600_v33, %v1223_v13  ;;  %v706_v38 = vmul.f32 %v2583_v16, %v186_v19 }
 0x104   : > { %v2139_v39 = vpop.eup %2138  ;;  %v1090_v34 = vmul.f32 %v2137_v30, %v2592_v24  ;;  %2146 = vpow2.f32 %v544_v26  ;;  %v998_v40 = vmul.f32 1.442695, %v899_v27  ;;  %v382_v35 = vmul.f32 %v317_v29, %v317_v29 }
 0x105   : > { %v2141_v41 = vpop.eup %2140  ;;  %v1608_v42 = vmul.f32 %v2139_v39, %v2602_v36  ;;  %v1417_v43 = vsub.f32 0.0, %v1353_v31  ;;  %v836_v44 = vmul.f32 %v771_v32, %v771_v32  ;;  %v1354_v45 = vmul.f32 %v1289_v37, %v1289_v37 }
 0x106   : > { %v2143_v46 = vpop.eup %2142  ;;  %v1154_v47 = vadd.f32 %v1090_v34, %v636_v6  ;;  %v637_v48 = vmul.f32 %v2141_v41, %v2572_v11  ;;  %2148 = vpow2.f32 %v998_v40  ;;  %v446_v49 = vsub.f32 0.0, %v382_v35  ;;  %v188_v6 = vld [vmem:[%s2547_s30 + $0x138] sm:$0xff] }
 0x107   : > { %v2145_v50 = vpop.eup %2144  ;;  %v1091_v51 = vmul.f32 %v2143_v46, %v2592_v24  ;;  %v1516_v52 = vmul.f32 1.442695, %v1417_v43  ;;  %v900_v53 = vsub.f32 0.0, %v836_v44  ;;  %v1418_v9 = vsub.f32 0.0, %v1354_v45 }
 0x108   : > { %v1672_v54 = vadd.f32 %v1608_v42, %v1154_v47  ;;  %v1609_v55 = vmul.f32 %v2145_v50, %v2602_v36  ;;  %v546_v56 = vmul.f32 1.442695, %v446_v49  ;;  %v318_v57 = vadd.f32 %v2559_v5, %v252_v23  ;;  %v189_v50 = vld [vmem:[%s2547_s30 + $0x140] sm:$0xff] }
 0x109   : > { %v1155_v59 = vadd.f32 %v1091_v51, %v637_v48  ;;  %2150 = vpow2.f32 %v1516_v52  ;;  %v1000_v60 = vmul.f32 1.442695, %v900_v53  ;;  %v1518_v61 = vmul.f32 1.442695, %v1418_v9 }
 0x10a   : > { %v2147_v62 = vpop.eup %2146  ;;  %1736 = vst [vmem:[%s2636_s11 + $0x108] sm:$0xff] %v1672_v54  ;;  %2152 = vpow2.f32 %v546_v56  ;;  %v383_v14 = vmul.f32 %v318_v57, %v318_v57  ;;  %v772_v63 = vadd.f32 %v2588_v20, %v706_v38  ;;  %v1224_v0 = vmul.f32 %v2595_v28, %v186_v19 }
 0x10b   : > { %v1673_v2 = vadd.f32 %v1609_v55, %v1155_v59  ;;  %v638_v3 = vmul.f32 %v2147_v62, %v2572_v11  ;;  %2154 = vpow2.f32 %v1000_v60  ;;  %v253_v4 = vmul.f32 %v2554_v1, %v187_v58 }
 0x10c   : > { %v2149_v7 = vpop.eup %2148  ;;  %2156 = vpow2.f32 %v1518_v61  ;;  %v447_v12 = vsub.f32 0.0, %v383_v14  ;;  %v837_v15 = vmul.f32 %v772_v63, %v772_v63  ;;  %v1290_v17 = vadd.f32 %v2600_v33, %v1224_v0  ;;  %v190_v63 = vld [vmem:[%s2547_s30 + $0x148] sm:$0xff] }
 0x10d   : > { %1737 = vst [vmem:[%s2636_s11 + $0x110] sm:$0xff] %v1673_v2  ;;  %v1092_v18 = vmul.f32 %v2149_v7, %v2592_v24  ;;  %v319_v21 = vadd.f32 %v2559_v5, %v253_v4  ;;  %v707_v19 = vmul.f32 %v2583_v16, %v187_v58  ;;  %v1225_v22 = vmul.f32 %v2595_v28, %v187_v58 }
 0x10e   : > { %v548_v8 = vmul.f32 1.442695, %v447_v12  ;;  %v901_v10 = vsub.f32 0.0, %v837_v15  ;;  %v1355_v25 = vmul.f32 %v1290_v17, %v1290_v17  ;;  %v254_v13 = vmul.f32 %v2554_v1, %v188_v6 }
 0x10f   : > { %v2151_v26 = vpop.eup %2150  ;;  %v1156_v27 = vadd.f32 %v1092_v18, %v638_v3  ;;  %v384_v29 = vmul.f32 %v319_v21, %v319_v21  ;;  %v773_v23 = vadd.f32 %v2588_v20, %v707_v19  ;;  %v1291_v30 = vadd.f32 %v2600_v33, %v1225_v22 }
 0x110   : > { %v2153_v31 = vpop.eup %2152  ;;  %v1610_v32 = vmul.f32 %v2151_v26, %v2602_v36  ;;  %2158 = vpow2.f32 %v548_v8  ;;  %v1002_v37 = vmul.f32 1.442695, %v901_v10  ;;  %v1419_v38 = vsub.f32 0.0, %v1355_v25 }
 0x111   : > { %v2155_v39 = vpop.eup %2154  ;;  %v639_v34 = vmul.f32 %v2153_v31, %v2572_v11  ;;  %v448_v40 = vsub.f32 0.0, %v384_v29  ;;  %v838_v35 = vmul.f32 %v773_v23, %v773_v23  ;;  %v1356_v41 = vmul.f32 %v1291_v30, %v1291_v30 }
 0x112   : > { %v2157_v42 = vpop.eup %2156  ;;  %v1674_v43 = vadd.f32 %v1610_v32, %v1156_v27  ;;  %v1093_v44 = vmul.f32 %v2155_v39, %v2592_v24  ;;  %2160 = vpow2.f32 %v1002_v37  ;;  %v1520_v45 = vmul.f32 1.442695, %v1419_v38 }
 0x113   : > { %v1611_v46 = vmul.f32 %v2157_v42, %v2602_v36  ;;  %v550_v47 = vmul.f32 1.442695, %v448_v40  ;;  %v902_v48 = vsub.f32 0.0, %v838_v35  ;;  %v1420_v49 = vsub.f32 0.0, %v1356_v41  ;;  %v191_v41 = vld [vmem:[%s2547_s30 + $0x150] sm:$0xff] }
 0x114   : > { %1738 = vst [vmem:[%s2636_s11 + $0x118] sm:$0xff] %v1674_v43  ;;  %v1157_v51 = vadd.f32 %v1093_v44, %v639_v34  ;;  %2162 = vpow2.f32 %v1520_v45  ;;  %v320_v52 = vadd.f32 %v2559_v5, %v254_v13  ;;  %v708_v53 = vmul.f32 %v2583_v16, %v188_v6 }
 0x115   : > { %2164 = vpow2.f32 %v550_v47  ;;  %v1004_v9 = vmul.f32 1.442695, %v902_v48  ;;  %v1522_v54 = vmul.f32 1.442695, %v1420_v49  ;;  %v1226_v55 = vmul.f32 %v2595_v28, %v188_v6 }
 0x116   : > { %v2159_v56 = vpop.eup %2158  ;;  %v1675_v57 = vadd.f32 %v1611_v46, %v1157_v51  ;;  %v385_v58 = vmul.f32 %v320_v52, %v320_v52  ;;  %v774_v59 = vadd.f32 %v2588_v20, %v708_v53  ;;  %v255_v60 = vmul.f32 %v2554_v1, %v189_v50 }
 0x117   : > { %v640_v61 = vmul.f32 %v2159_v56, %v2572_v11  ;;  %2166 = vpow2.f32 %v1004_v9  ;;  %v1292_v62 = vadd.f32 %v2600_v33, %v1226_v55  ;;  %v709_v14 = vmul.f32 %v2583_v16, %v189_v50 }
 0x118   : > { %v2161_v0 = vpop.eup %2160  ;;  %1739 = vst [vmem:[%s2636_s11 + $0x120] sm:$0xff] %v1675_v57  ;;  %2168 = vpow2.f32 %v1522_v54  ;;  %v449_v2 = vsub.f32 0.0, %v385_v58  ;;  %v839_v3 = vmul.f32 %v774_v59, %v774_v59  ;;  %v321_v4 = vadd.f32 %v2559_v5, %v255_v60 }
 0x119   : > { %v1094_v6 = vmul.f32 %v2161_v0, %v2592_v24  ;;  %v1357_v7 = vmul.f32 %v1292_v62, %v1292_v62  ;;  %v775_v12 = vadd.f32 %v2588_v20, %v709_v14  ;;  %v1227_v15 = vmul.f32 %v2595_v28, %v189_v50 }
 0x11a   : > { %v2163_v17 = vpop.eup %2162  ;;  %v552_v18 = vmul.f32 1.442695, %v449_v2  ;;  %v903_v21 = vsub.f32 0.0, %v839_v3  ;;  %v386_v19 = vmul.f32 %v321_v4, %v321_v4  ;;  %v256_v22 = vmul.f32 %v2554_v1, %v190_v63 }
 0x11b   : > { %v2165_v8 = vpop.eup %2164  ;;  %v1158_v10 = vadd.f32 %v1094_v6, %v640_v61  ;;  %v1612_v25 = vmul.f32 %v2163_v17, %v2602_v36  ;;  %v1421_v13 = vsub.f32 0.0, %v1357_v7  ;;  %v840_v26 = vmul.f32 %v775_v12, %v775_v12 }
 0x11c   : > { %v641_v27 = vmul.f32 %v2165_v8, %v2572_v11  ;;  %2170 = vpow2.f32 %v552_v18  ;;  %v1006_v29 = vmul.f32 1.442695, %v903_v21  ;;  %v450_v23 = vsub.f32 0.0, %v386_v19 }
 0x11d   : > { %v2167_v30 = vpop.eup %2166  ;;  %v1676_v31 = vadd.f32 %v1612_v25, %v1158_v10  ;;  %v1524_v32 = vmul.f32 1.442695, %v1421_v13  ;;  %v904_v37 = vsub.f32 0.0, %v840_v26  ;;  %v1293_v38 = vadd.f32 %v2600_v33, %v1227_v15  ;;  %v192_v15 = vld [vmem:[%s2547_s30 + $0x158] sm:$0xff] }
 0x11e   : > { %v2169_v39 = vpop.eup %2168  ;;  %v1095_v34 = vmul.f32 %v2167_v30, %v2592_v24  ;;  %2172 = vpow2.f32 %v1006_v29  ;;  %v554_v40 = vmul.f32 1.442695, %v450_v23  ;;  %v322_v35 = vadd.f32 %v2559_v5, %v256_v22  ;;  %v193_v30 = vld [vmem:[%s2547_s30 + $0x160] sm:$0xff] }
 0x11f   : > { %1740 = vst [vmem:[%s2636_s11 + $0x128] sm:$0xff] %v1676_v31  ;;  %v1613_v42 = vmul.f32 %v2169_v39, %v2602_v36  ;;  %2174 = vpow2.f32 %v1524_v32  ;;  %v1008_v43 = vmul.f32 1.442695, %v904_v37  ;;  %v1358_v44 = vmul.f32 %v1293_v38, %v1293_v38 }
 0x120   : > { %v1159_v45 = vadd.f32 %v1095_v34, %v641_v27  ;;  %2176 = vpow2.f32 %v554_v40  ;;  %v387_v46 = vmul.f32 %v322_v35, %v322_v35  ;;  %v710_v47 = vmul.f32 %v2583_v16, %v190_v63 }
 0x121   : > { %2178 = vpow2.f32 %v1008_v43  ;;  %v1422_v48 = vsub.f32 0.0, %v1358_v44  ;;  %v1228_v49 = vmul.f32 %v2595_v28, %v190_v63  ;;  %v257_v50 = vmul.f32 %v2554_v1, %v191_v41 }
 0x122   : > { %v2171_v51 = vpop.eup %2170  ;;  %v1677_v52 = vadd.f32 %v1613_v42, %v1159_v45  ;;  %v451_v53 = vsub.f32 0.0, %v387_v46  ;;  %v776_v9 = vadd.f32 %v2588_v20, %v710_v47  ;;  %v711_v54 = vmul.f32 %v2583_v16, %v191_v41  ;;  %v194_v47 = vld [vmem:[%s2547_s30 + $0x168] sm:$0xff] }
 0x123   : > { %v642_v55 = vmul.f32 %v2171_v51, %v2572_v11  ;;  %v1526_v56 = vmul.f32 1.442695, %v1422_v48  ;;  %v1294_v57 = vadd.f32 %v2600_v33, %v1228_v49  ;;  %v323_v58 = vadd.f32 %v2559_v5, %v257_v50 }
 0x124   : > { %v2173_v59 = vpop.eup %2172  ;;  %1741 = vst [vmem:[%s2636_s11 + $0x130] sm:$0xff] %v1677_v52  ;;  %v556_v60 = vmul.f32 1.442695, %v451_v53  ;;  %v841_v61 = vmul.f32 %v776_v9, %v776_v9  ;;  %v777_v62 = vadd.f32 %v2588_v20, %v711_v54  ;;  %v1229_v14 = vmul.f32 %v2595_v28, %v191_v41 }
 0x125   : > { %v2175_v63 = vpop.eup %2174  ;;  %v1096_v0 = vmul.f32 %v2173_v59, %v2592_v24  ;;  %2180 = vpow2.f32 %v1526_v56  ;;  %v1359_v2 = vmul.f32 %v1294_v57, %v1294_v57  ;;  %v388_v3 = vmul.f32 %v323_v58, %v323_v58 }
 0x126   : > { %v2177_v4 = vpop.eup %2176  ;;  %v1614_v6 = vmul.f32 %v2175_v63, %v2602_v36  ;;  %2182 = vpow2.f32 %v556_v60  ;;  %v905_v7 = vsub.f32 0.0, %v841_v61  ;;  %v842_v12 = vmul.f32 %v777_v62, %v777_v62 }
 0x127   : > { %v2179_v17 = vpop.eup %2178  ;;  %v1160_v18 = vadd.f32 %v1096_v0, %v642_v55  ;;  %v643_v21 = vmul.f32 %v2177_v4, %v2572_v11  ;;  %v1423_v19 = vsub.f32 0.0, %v1359_v2  ;;  %v452_v22 = vsub.f32 0.0, %v388_v3 }
 0x128   : > { %v1097_v8 = vmul.f32 %v2179_v17, %v2592_v24  ;;  %v1010_v10 = vmul.f32 1.442695, %v905_v7  ;;  %v906_v25 = vsub.f32 0.0, %v842_v12  ;;  %v1295_v13 = vadd.f32 %v2600_v33, %v1229_v14 }
 0x129   : > { %v1678_v26 = vadd.f32 %v1614_v6, %v1160_v18  ;;  %v1528_v27 = vmul.f32 1.442695, %v1423_v19  ;;  %v558_v29 = vmul.f32 1.442695, %v452_v22  ;;  %v258_v23 = vmul.f32 %v2554_v1, %v192_v15 }
 0x12a   : > { %v1161_v31 = vadd.f32 %v1097_v8, %v643_v21  ;;  %2184 = vpow2.f32 %v1010_v10  ;;  %v1012_v32 = vmul.f32 1.442695, %v906_v25  ;;  %v1360_v37 = vmul.f32 %v1295_v13, %v1295_v13  ;;  %v195_v25 = vld [vmem:[%s2547_s30 + $0x170] sm:$0xff] }
 0x12b   : > { %v2181_v38 = vpop.eup %2180  ;;  %1742 = vst [vmem:[%s2636_s11 + $0x138] sm:$0xff] %v1678_v26  ;;  %2186 = vpow2.f32 %v1528_v27  ;;  %v324_v39 = vadd.f32 %v2559_v5, %v258_v23  ;;  %v712_v34 = vmul.f32 %v2583_v16, %v192_v15  ;;  %v1230_v40 = vmul.f32 %v2595_v28, %v192_v15 }
 0x12c   : > { %v2183_v35 = vpop.eup %2182  ;;  %v1615_v41 = vmul.f32 %v2181_v38, %v2602_v36  ;;  %2188 = vpow2.f32 %v558_v29  ;;  %v1424_v42 = vsub.f32 0.0, %v1360_v37  ;;  %v259_v43 = vmul.f32 %v2554_v1, %v193_v30 }
 0x12d   : > { %v644_v44 = vmul.f32 %v2183_v35, %v2572_v11  ;;  %2190 = vpow2.f32 %v1012_v32  ;;  %v389_v45 = vmul.f32 %v324_v39, %v324_v39  ;;  %v778_v46 = vadd.f32 %v2588_v20, %v712_v34 }
 0x12e   : > { %v1679_v48 = vadd.f32 %v1615_v41, %v1161_v31  ;;  %v1530_v49 = vmul.f32 1.442695, %v1424_v42  ;;  %v1296_v50 = vadd.f32 %v2600_v33, %v1230_v40  ;;  %v325_v51 = vadd.f32 %v2559_v5, %v259_v43 }
 0x12f   : > { %v453_v52 = vsub.f32 0.0, %v389_v45  ;;  %v843_v53 = vmul.f32 %v778_v46, %v778_v46  ;;  %v713_v9 = vmul.f32 %v2583_v16, %v193_v30  ;;  %v1231_v54 = vmul.f32 %v2595_v28, %v193_v30 }
 0x130   : > { %v2185_v55 = vpop.eup %2184  ;;  %1743 = vst [vmem:[%s2636_s11 + $0x140] sm:$0xff] %v1679_v48  ;;  %2192 = vpow2.f32 %v1530_v49  ;;  %v1361_v56 = vmul.f32 %v1296_v50, %v1296_v50  ;;  %v390_v57 = vmul.f32 %v325_v51, %v325_v51  ;;  %v260_v58 = vmul.f32 %v2554_v1, %v194_v47 }
 0x131   : > { %v2187_v59 = vpop.eup %2186  ;;  %v1098_v60 = vmul.f32 %v2185_v55, %v2592_v24  ;;  %v560_v61 = vmul.f32 1.442695, %v453_v52  ;;  %v907_v62 = vsub.f32 0.0, %v843_v53  ;;  %v779_v14 = vadd.f32 %v2588_v20, %v713_v9 }
 0x132   : > { %v2189_v63 = vpop.eup %2188  ;;  %v1616_v0 = vmul.f32 %v2187_v59, %v2602_v36  ;;  %v1425_v2 = vsub.f32 0.0, %v1361_v56  ;;  %v454_v3 = vsub.f32 0.0, %v390_v57  ;;  %v1297_v4 = vadd.f32 %v2600_v33, %v1231_v54  ;;  %v196_v54 = vld [vmem:[%s2547_s30 + $0x178] sm:$0xff] }
 0x133   : > { %v2191_v6 = vpop.eup %2190  ;;  %v1162_v7 = vadd.f32 %v1098_v60, %v644_v44  ;;  %v645_v12 = vmul.f32 %v2189_v63, %v2572_v11  ;;  %2194 = vpow2.f32 %v560_v61  ;;  %v1014_v15 = vmul.f32 1.442695, %v907_v62 }
 0x134   : > { %v1099_v17 = vmul.f32 %v2191_v6, %v2592_v24  ;;  %v1532_v18 = vmul.f32 1.442695, %v1425_v2  ;;  %v562_v21 = vmul.f32 1.442695, %v454_v3  ;;  %v844_v19 = vmul.f32 %v779_v14, %v779_v14 }
 0x135   : > { %v1680_v22 = vadd.f32 %v1616_v0, %v1162_v7  ;;  %2196 = vpow2.f32 %v1014_v15  ;;  %v1362_v8 = vmul.f32 %v1297_v4, %v1297_v4  ;;  %v326_v10 = vadd.f32 %v2559_v5, %v260_v58 }
 0x136   : > { %v2193_v13 = vpop.eup %2192  ;;  %v1163_v26 = vadd.f32 %v1099_v17, %v645_v12  ;;  %2198 = vpow2.f32 %v1532_v18  ;;  %v908_v27 = vsub.f32 0.0, %v844_v19  ;;  %v714_v29 = vmul.f32 %v2583_v16, %v194_v47 }
 0x137   : > { %1744 = vst [vmem:[%s2636_s11 + $0x148] sm:$0xff] %v1680_v22  ;;  %v1617_v23 = vmul.f32 %v2193_v13, %v2602_v36  ;;  %2200 = vpow2.f32 %v562_v21  ;;  %v1426_v30 = vsub.f32 0.0, %v1362_v8  ;;  %v391_v31 = vmul.f32 %v326_v10, %v326_v10  ;;  %v197_v10 = vld [vmem:[%s2547_s30 + $0x180] sm:$0xff] }
 0x138   : > { %v1016_v32 = vmul.f32 1.442695, %v908_v27  ;;  %v780_v37 = vadd.f32 %v2588_v20, %v714_v29  ;;  %v1232_v38 = vmul.f32 %v2595_v28, %v194_v47  ;;  %v261_v39 = vmul.f32 %v2554_v1, %v195_v25 }
 0x139   : > { %v2195_v34 = vpop.eup %2194  ;;  %v1681_v40 = vadd.f32 %v1617_v23, %v1163_v26  ;;  %v1534_v35 = vmul.f32 1.442695, %v1426_v30  ;;  %v455_v41 = vsub.f32 0.0, %v391_v31  ;;  %v715_v42 = vmul.f32 %v2583_v16, %v195_v25 }
 0x13a   : > { %v646_v43 = vmul.f32 %v2195_v34, %v2572_v11  ;;  %2202 = vpow2.f32 %v1016_v32  ;;  %v845_v44 = vmul.f32 %v780_v37, %v780_v37  ;;  %v1298_v45 = vadd.f32 %v2600_v33, %v1232_v38 }
 0x13b   : > { %v2197_v46 = vpop.eup %2196  ;;  %1745 = vst [vmem:[%s2636_s11 + $0x150] sm:$0xff] %v1681_v40  ;;  %2204 = vpow2.f32 %v1534_v35  ;;  %v564_v48 = vmul.f32 1.442695, %v455_v41  ;;  %v327_v47 = vadd.f32 %v2559_v5, %v261_v39  ;;  %v781_v49 = vadd.f32 %v2588_v20, %v715_v42 }
 0x13c   : > { %v2199_v50 = vpop.eup %2198  ;;  %v1100_v51 = vmul.f32 %v2197_v46, %v2592_v24  ;;  %v909_v52 = vsub.f32 0.0, %v845_v44  ;;  %v1363_v53 = vmul.f32 %v1298_v45, %v1298_v45  ;;  %v1233_v9 = vmul.f32 %v2595_v28, %v195_v25 }
 0x13d   : > { %v2201_v55 = vpop.eup %2200  ;;  %v1618_v56 = vmul.f32 %v2199_v50, %v2602_v36  ;;  %2206 = vpow2.f32 %v564_v48  ;;  %v392_v57 = vmul.f32 %v327_v47, %v327_v47  ;;  %v846_v58 = vmul.f32 %v781_v49, %v781_v49 }
 0x13e   : > { %v1164_v59 = vadd.f32 %v1100_v51, %v646_v43  ;;  %v647_v60 = vmul.f32 %v2201_v55, %v2572_v11  ;;  %v1018_v61 = vmul.f32 1.442695, %v909_v52  ;;  %v1427_v62 = vsub.f32 0.0, %v1363_v53 }
 0x13f   : > { %v456_v14 = vsub.f32 0.0, %v392_v57  ;;  %v910_v63 = vsub.f32 0.0, %v846_v58  ;;  %v1299_v0 = vadd.f32 %v2600_v33, %v1233_v9  ;;  %v262_v2 = vmul.f32 %v2554_v1, %v196_v54 }
 0x140   : > { %v2203_v3 = vpop.eup %2202  ;;  %v1682_v4 = vadd.f32 %v1618_v56, %v1164_v59  ;;  %2208 = vpow2.f32 %v1018_v61  ;;  %v1536_v6 = vmul.f32 1.442695, %v1427_v62  ;;  %v716_v7 = vmul.f32 %v2583_v16, %v196_v54 }
 0x141   : > { %v2205_v12 = vpop.eup %2204  ;;  %v1101_v15 = vmul.f32 %v2203_v3, %v2592_v24  ;;  %v566_v17 = vmul.f32 1.442695, %v456_v14  ;;  %v1020_v18 = vmul.f32 1.442695, %v910_v63  ;;  %v1364_v21 = vmul.f32 %v1299_v0, %v1299_v0 }
 0x142   : > { %1746 = vst [vmem:[%s2636_s11 + $0x158] sm:$0xff] %v1682_v4  ;;  %v1619_v19 = vmul.f32 %v2205_v12, %v2602_v36  ;;  %2210 = vpow2.f32 %v1536_v6  ;;  %v328_v22 = vadd.f32 %v2559_v5, %v262_v2  ;;  %v782_v8 = vadd.f32 %v2588_v20, %v716_v7  ;;  %v199_v2 = vld [vmem:[%s2547_s30 + $0x190] sm:$0xff] }
 0x143   : > { %v2207_v25 = vpop.eup %2206  ;;  %v1165_v13 = vadd.f32 %v1101_v15, %v647_v60  ;;  %2212 = vpow2.f32 %v566_v17  ;;  %v1428_v26 = vsub.f32 0.0, %v1364_v21  ;;  %v1234_v27 = vmul.f32 %v2595_v28, %v196_v54  ;;  %v198_v54 = vld [vmem:[%s2547_s30 + $0x188] sm:$0xff] }
 0x144   : > { %v648_v29 = vmul.f32 %v2207_v25, %v2572_v11  ;;  %2214 = vpow2.f32 %v1020_v18  ;;  %v393_v23 = vmul.f32 %v328_v22, %v328_v22  ;;  %v847_v30 = vmul.f32 %v782_v8, %v782_v8 }
 0x145   : > { %v1683_v31 = vadd.f32 %v1619_v19, %v1165_v13  ;;  %v1538_v32 = vmul.f32 1.442695, %v1428_v26  ;;  %v1300_v37 = vadd.f32 %v2600_v33, %v1234_v27  ;;  %v263_v38 = vmul.f32 %v2554_v1, %v197_v10 }
 0x146   : > { %v2209_v39 = vpop.eup %2208  ;;  %v457_v34 = vsub.f32 0.0, %v393_v23  ;;  %v911_v40 = vsub.f32 0.0, %v847_v30  ;;  %v717_v35 = vmul.f32 %v2583_v16, %v197_v10  ;;  %v1235_v41 = vmul.f32 %v2595_v28, %v197_v10 }
 0x147   : > { %1747 = vst [vmem:[%s2636_s11 + $0x160] sm:$0xff] %v1683_v31  ;;  %v1102_v42 = vmul.f32 %v2209_v39, %v2592_v24  ;;  %2216 = vpow2.f32 %v1538_v32  ;;  %v1365_v43 = vmul.f32 %v1300_v37, %v1300_v37  ;;  %v329_v44 = vadd.f32 %v2559_v5, %v263_v38 }
 0x148   : > { %v2211_v45 = vpop.eup %2210  ;;  %v568_v46 = vmul.f32 1.442695, %v457_v34  ;;  %v1022_v48 = vmul.f32 1.442695, %v911_v40  ;;  %v783_v47 = vadd.f32 %v2588_v20, %v717_v35  ;;  %v1301_v49 = vadd.f32 %v2600_v33, %v1235_v41  ;;  %v200_v41 = vld [vmem:[%s2547_s30 + $0x198] sm:$0xff] }
 0x149   : > { %v2213_v50 = vpop.eup %2212  ;;  %v1166_v51 = vadd.f32 %v1102_v42, %v648_v29  ;;  %v1620_v52 = vmul.f32 %v2211_v45, %v2602_v36  ;;  %v1429_v53 = vsub.f32 0.0, %v1365_v43  ;;  %v394_v9 = vmul.f32 %v329_v44, %v329_v44 }
 0x14a   : > { %v2215_v55 = vpop.eup %2214  ;;  %v649_v56 = vmul.f32 %v2213_v50, %v2572_v11  ;;  %2218 = vpow2.f32 %v568_v46  ;;  %v848_v57 = vmul.f32 %v783_v47, %v783_v47  ;;  %v1366_v58 = vmul.f32 %v1301_v49, %v1301_v49 }
 0x14b   : > { %v1684_v59 = vadd.f32 %v1620_v52, %v1166_v51  ;;  %v1103_v60 = vmul.f32 %v2215_v55, %v2592_v24  ;;  %2220 = vpow2.f32 %v1022_v48  ;;  %v1540_v61 = vmul.f32 1.442695, %v1429_v53 }
 0x14c   : > { %v458_v62 = vsub.f32 0.0, %v394_v9  ;;  %v912_v14 = vsub.f32 0.0, %v848_v57  ;;  %v1430_v63 = vsub.f32 0.0, %v1366_v58  ;;  %v264_v0 = vmul.f32 %v2554_v1, %v198_v54 }
 0x14d   : > { %v2217_v3 = vpop.eup %2216  ;;  %1748 = vst [vmem:[%s2636_s11 + $0x168] sm:$0xff] %v1684_v59  ;;  %v1167_v4 = vadd.f32 %v1103_v60, %v649_v56  ;;  %2222 = vpow2.f32 %v1540_v61  ;;  %v718_v6 = vmul.f32 %v2583_v16, %v198_v54  ;;  %v1236_v7 = vmul.f32 %v2595_v28, %v198_v54 }
 0x14e   : > { %v1621_v12 = vmul.f32 %v2217_v3, %v2602_v36  ;;  %v570_v15 = vmul.f32 1.442695, %v458_v62  ;;  %v1024_v17 = vmul.f32 1.442695, %v912_v14  ;;  %v1542_v18 = vmul.f32 1.442695, %v1430_v63 }
 0x14f   : > { %v330_v21 = vadd.f32 %v2559_v5, %v264_v0  ;;  %v784_v19 = vadd.f32 %v2588_v20, %v718_v6  ;;  %v1302_v22 = vadd.f32 %v2600_v33, %v1236_v7  ;;  %v265_v8 = vmul.f32 %v2554_v1, %v199_v2  ;;  %v201_v62 = vld [vmem:[%s2547_s30 + $0x1a0] sm:$0xff] }
 0x150   : > { %v2219_v10 = vpop.eup %2218  ;;  %v1685_v25 = vadd.f32 %v1621_v12, %v1167_v4  ;;  %2224 = vpow2.f32 %v570_v15  ;;  %v719_v13 = vmul.f32 %v2583_v16, %v199_v2  ;;  %v1237_v26 = vmul.f32 %v2595_v28, %v199_v2  ;;  %v202_v15 = vld [vmem:[%s2547_s30 + $0x1a8] sm:$0xff] }
 0x151   : > { %v2221_v27 = vpop.eup %2220  ;;  %v650_v29 = vmul.f32 %v2219_v10, %v2572_v11  ;;  %2226 = vpow2.f32 %v1024_v17  ;;  %v395_v23 = vmul.f32 %v330_v21, %v330_v21  ;;  %v849_v30 = vmul.f32 %v784_v19, %v784_v19 }
 0x152   : > { %1749 = vst [vmem:[%s2636_s11 + $0x170] sm:$0xff] %v1685_v25  ;;  %v1104_v31 = vmul.f32 %v2221_v27, %v2592_v24  ;;  %2228 = vpow2.f32 %v1542_v18  ;;  %v1367_v32 = vmul.f32 %v1302_v22, %v1302_v22  ;;  %v331_v37 = vadd.f32 %v2559_v5, %v265_v8 }
 0x153   : > { %v2223_v38 = vpop.eup %2222  ;;  %v459_v39 = vsub.f32 0.0, %v395_v23  ;;  %v913_v34 = vsub.f32 0.0, %v849_v30  ;;  %v785_v40 = vadd.f32 %v2588_v20, %v719_v13  ;;  %v1303_v35 = vadd.f32 %v2600_v33, %v1237_v26 }
 0x154   : > { %v1168_v42 = vadd.f32 %v1104_v31, %v650_v29  ;;  %v1622_v43 = vmul.f32 %v2223_v38, %v2602_v36  ;;  %v1431_v44 = vsub.f32 0.0, %v1367_v32  ;;  %v396_v45 = vmul.f32 %v331_v37, %v331_v37 }
 0x155   : > { %v572_v46 = vmul.f32 1.442695, %v459_v39  ;;  %v1026_v48 = vmul.f32 1.442695, %v913_v34  ;;  %v850_v47 = vmul.f32 %v785_v40, %v785_v40  ;;  %v1368_v49 = vmul.f32 %v1303_v35, %v1303_v35 }
 0x156   : > { %v2225_v50 = vpop.eup %2224  ;;  %v1686_v51 = vadd.f32 %v1622_v43, %v1168_v42  ;;  %v1544_v52 = vmul.f32 1.442695, %v1431_v44  ;;  %v460_v53 = vsub.f32 0.0, %v396_v45  ;;  %v266_v9 = vmul.f32 %v2554_v1, %v200_v41 }
 0x157   : > { %v2227_v54 = vpop.eup %2226  ;;  %v651_v55 = vmul.f32 %v2225_v50, %v2572_v11  ;;  %2230 = vpow2.f32 %v572_v46  ;;  %v914_v56 = vsub.f32 0.0, %v850_v47  ;;  %v1432_v57 = vsub.f32 0.0, %v1368_v49 }
 0x158   : > { %v2229_v58 = vpop.eup %2228  ;;  %1750 = vst [vmem:[%s2636_s11 + $0x178] sm:$0xff] %v1686_v51  ;;  %v1105_v59 = vmul.f32 %v2227_v54, %v2592_v24  ;;  %2232 = vpow2.f32 %v1026_v48  ;;  %v574_v60 = vmul.f32 1.442695, %v460_v53  ;;  %v332_v61 = vadd.f32 %v2559_v5, %v266_v9  ;;  %v203_v54 = vld [vmem:[%s2547_s30 + $0x1b0] sm:$0xff] }
 0x159   : > { %v1623_v14 = vmul.f32 %v2229_v58, %v2602_v36  ;;  %2234 = vpow2.f32 %v1544_v52  ;;  %v1028_v63 = vmul.f32 1.442695, %v914_v56  ;;  %v1546_v0 = vmul.f32 1.442695, %v1432_v57 }
 0x15a   : > { %v1169_v2 = vadd.f32 %v1105_v59, %v651_v55  ;;  %2236 = vpow2.f32 %v574_v60  ;;  %v397_v3 = vmul.f32 %v332_v61, %v332_v61  ;;  %v720_v4 = vmul.f32 %v2583_v16, %v200_v41 }
 0x15b   : > { %2238 = vpow2.f32 %v1028_v63  ;;  %v1238_v6 = vmul.f32 %v2595_v28, %v200_v41  ;;  %v267_v7 = vmul.f32 %v2554_v1, %v201_v62  ;;  %v721_v12 = vmul.f32 %v2583_v16, %v201_v62 }
 0x15c   : > { %v1687_v17 = vadd.f32 %v1623_v14, %v1169_v2  ;;  %2240 = vpow2.f32 %v1546_v0  ;;  %v461_v18 = vsub.f32 0.0, %v397_v3  ;;  %v786_v21 = vadd.f32 %v2588_v20, %v720_v4  ;;  %v204_v0 = vld [vmem:[%s2547_s30 + $0x1b8] sm:$0xff] }
 0x15d   : > { %v2231_v19 = vpop.eup %2230  ;;  %v1304_v22 = vadd.f32 %v2600_v33, %v1238_v6  ;;  %v333_v8 = vadd.f32 %v2559_v5, %v267_v7  ;;  %v787_v10 = vadd.f32 %v2588_v20, %v721_v12  ;;  %v1239_v25 = vmul.f32 %v2595_v28, %v201_v62 }
 0x15e   : > { %v2233_v13 = vpop.eup %2232  ;;  %1751 = vst [vmem:[%s2636_s11 + $0x180] sm:$0xff] %v1687_v17  ;;  %v652_v26 = vmul.f32 %v2231_v19, %v2572_v11  ;;  %v576_v27 = vmul.f32 1.442695, %v461_v18  ;;  %v851_v29 = vmul.f32 %v786_v21, %v786_v21  ;;  %v268_v23 = vmul.f32 %v2554_v1, %v202_v15 }
 0x15f   : > { %v2235_v30 = vpop.eup %2234  ;;  %v1106_v31 = vmul.f32 %v2233_v13, %v2592_v24  ;;  %v1369_v32 = vmul.f32 %v1304_v22, %v1304_v22  ;;  %v398_v37 = vmul.f32 %v333_v8, %v333_v8  ;;  %v852_v38 = vmul.f32 %v787_v10, %v787_v10 }
 0x160   : > { %v2237_v39 = vpop.eup %2236  ;;  %v1624_v34 = vmul.f32 %v2235_v30, %v2602_v36  ;;  %2242 = vpow2.f32 %v576_v27  ;;  %v915_v40 = vsub.f32 0.0, %v851_v29  ;;  %v1305_v35 = vadd.f32 %v2600_v33, %v1239_v25 }
 0x161   : > { %v2239_v41 = vpop.eup %2238  ;;  %v1170_v42 = vadd.f32 %v1106_v31, %v652_v26  ;;  %v653_v43 = vmul.f32 %v2237_v39, %v2572_v11  ;;  %v1433_v44 = vsub.f32 0.0, %v1369_v32  ;;  %v462_v45 = vsub.f32 0.0, %v398_v37 }
 0x162   : > { %v2241_v46 = vpop.eup %2240  ;;  %v1107_v48 = vmul.f32 %v2239_v41, %v2592_v24  ;;  %v1030_v47 = vmul.f32 1.442695, %v915_v40  ;;  %v916_v49 = vsub.f32 0.0, %v852_v38  ;;  %v1370_v50 = vmul.f32 %v1305_v35, %v1305_v35 }
 0x163   : > { %v1688_v51 = vadd.f32 %v1624_v34, %v1170_v42  ;;  %v1625_v52 = vmul.f32 %v2241_v46, %v2602_v36  ;;  %v1548_v53 = vmul.f32 1.442695, %v1433_v44  ;;  %v578_v9 = vmul.f32 1.442695, %v462_v45 }
 0x164   : > { %v1171_v55 = vadd.f32 %v1107_v48, %v653_v43  ;;  %2244 = vpow2.f32 %v1030_v47  ;;  %v1032_v56 = vmul.f32 1.442695, %v916_v49  ;;  %v1434_v57 = vsub.f32 0.0, %v1370_v50  ;;  %v205_v49 = vld [vmem:[%s2547_s30 + $0x1c0] sm:$0xff] }
 0x165   : > { %1752 = vst [vmem:[%s2636_s11 + $0x188] sm:$0xff] %v1688_v51  ;;  %2246 = vpow2.f32 %v1548_v53  ;;  %v334_v58 = vadd.f32 %v2559_v5, %v268_v23  ;;  %v722_v59 = vmul.f32 %v2583_v16, %v202_v15  ;;  %v1240_v60 = vmul.f32 %v2595_v28, %v202_v15 }
 0x166   : > { %v2243_v61 = vpop.eup %2242  ;;  %v1689_v62 = vadd.f32 %v1625_v52, %v1171_v55  ;;  %2248 = vpow2.f32 %v578_v9  ;;  %v1550_v14 = vmul.f32 1.442695, %v1434_v57  ;;  %v269_v63 = vmul.f32 %v2554_v1, %v203_v54 }
 0x167   : > { %v654_v2 = vmul.f32 %v2243_v61, %v2572_v11  ;;  %2250 = vpow2.f32 %v1032_v56  ;;  %v399_v3 = vmul.f32 %v334_v58, %v334_v58  ;;  %v788_v4 = vadd.f32 %v2588_v20, %v722_v59 }
 0x168   : > { %1753 = vst [vmem:[%s2636_s11 + $0x190] sm:$0xff] %v1689_v62  ;;  %2252 = vpow2.f32 %v1550_v14  ;;  %v1306_v6 = vadd.f32 %v2600_v33, %v1240_v60  ;;  %v335_v7 = vadd.f32 %v2559_v5, %v269_v63  ;;  %v723_v12 = vmul.f32 %v2583_v16, %v203_v54 }
 0x169   : > { %v463_v15 = vsub.f32 0.0, %v399_v3  ;;  %v853_v17 = vmul.f32 %v788_v4, %v788_v4  ;;  %v1241_v18 = vmul.f32 %v2595_v28, %v203_v54  ;;  %v270_v21 = vmul.f32 %v2554_v1, %v204_v0 }
 0x16a   : > { %v2245_v19 = vpop.eup %2244  ;;  %v1371_v22 = vmul.f32 %v1306_v6, %v1306_v6  ;;  %v400_v8 = vmul.f32 %v335_v7, %v335_v7  ;;  %v789_v10 = vadd.f32 %v2588_v20, %v723_v12  ;;  %v724_v25 = vmul.f32 %v2583_v16, %v204_v0 }
 0x16b   : > { %v2247_v13 = vpop.eup %2246  ;;  %v1108_v26 = vmul.f32 %v2245_v19, %v2592_v24  ;;  %v580_v27 = vmul.f32 1.442695, %v463_v15  ;;  %v917_v29 = vsub.f32 0.0, %v853_v17  ;;  %v1307_v23 = vadd.f32 %v2600_v33, %v1241_v18 }
 0x16c   : > { %v2249_v30 = vpop.eup %2248  ;;  %v1626_v31 = vmul.f32 %v2247_v13, %v2602_v36  ;;  %v1435_v32 = vsub.f32 0.0, %v1371_v22  ;;  %v464_v37 = vsub.f32 0.0, %v400_v8  ;;  %v854_v38 = vmul.f32 %v789_v10, %v789_v10  ;;  %v206_v13 = vld [vmem:[%s2547_s30 + $0x1c8] sm:$0xff] }
 0x16d   : > { %v2251_v39 = vpop.eup %2250  ;;  %v1172_v34 = vadd.f32 %v1108_v26, %v654_v2  ;;  %v655_v40 = vmul.f32 %v2249_v30, %v2572_v11  ;;  %2254 = vpow2.f32 %v580_v27  ;;  %v1034_v35 = vmul.f32 1.442695, %v917_v29 }
 0x16e   : > { %v2253_v41 = vpop.eup %2252  ;;  %v1109_v42 = vmul.f32 %v2251_v39, %v2592_v24  ;;  %v1552_v43 = vmul.f32 1.442695, %v1435_v32  ;;  %v582_v44 = vmul.f32 1.442695, %v464_v37  ;;  %v918_v45 = vsub.f32 0.0, %v854_v38 }
 0x16f   : > { %v1690_v46 = vadd.f32 %v1626_v31, %v1172_v34  ;;  %v1627_v48 = vmul.f32 %v2253_v41, %v2602_v36  ;;  %2256 = vpow2.f32 %v1034_v35  ;;  %v1372_v47 = vmul.f32 %v1307_v23, %v1307_v23 }
 0x170   : > { %v1173_v50 = vadd.f32 %v1109_v42, %v655_v40  ;;  %2258 = vpow2.f32 %v1552_v43  ;;  %v1036_v51 = vmul.f32 1.442695, %v918_v45  ;;  %v336_v52 = vadd.f32 %v2559_v5, %v270_v21  ;;  %v207_v40 = vld [vmem:[%s2547_s30 + $0x1d0] sm:$0xff] }
 0x171   : > { %1754 = vst [vmem:[%s2636_s11 + $0x198] sm:$0xff] %v1690_v46  ;;  %2260 = vpow2.f32 %v582_v44  ;;  %v1436_v53 = vsub.f32 0.0, %v1372_v47  ;;  %v790_v9 = vadd.f32 %v2588_v20, %v724_v25  ;;  %v1242_v54 = vmul.f32 %v2595_v28, %v204_v0 }
 0x172   : > { %v1691_v55 = vadd.f32 %v1627_v48, %v1173_v50  ;;  %2262 = vpow2.f32 %v1036_v51  ;;  %v401_v56 = vmul.f32 %v336_v52, %v336_v52  ;;  %v271_v57 = vmul.f32 %v2554_v1, %v205_v49 }
 0x173   : > { %v2255_v58 = vpop.eup %2254  ;;  %v1554_v59 = vmul.f32 1.442695, %v1436_v53  ;;  %v855_v60 = vmul.f32 %v790_v9, %v790_v9  ;;  %v1308_v61 = vadd.f32 %v2600_v33, %v1242_v54  ;;  %v725_v62 = vmul.f32 %v2583_v16, %v205_v49 }
 0x174   : > { %1755 = vst [vmem:[%s2636_s11 + $0x1a0] sm:$0xff] %v1691_v55  ;;  %v656_v14 = vmul.f32 %v2255_v58, %v2572_v11  ;;  %v465_v63 = vsub.f32 0.0, %v401_v56  ;;  %v337_v2 = vadd.f32 %v2559_v5, %v271_v57  ;;  %v1243_v0 = vmul.f32 %v2595_v28, %v205_v49 }
 0x175   : > { %v2257_v3 = vpop.eup %2256  ;;  %2264 = vpow2.f32 %v1554_v59  ;;  %v919_v4 = vsub.f32 0.0, %v855_v60  ;;  %v1373_v6 = vmul.f32 %v1308_v61, %v1308_v61  ;;  %v791_v7 = vadd.f32 %v2588_v20, %v725_v62 }
 0x176   : > { %v2259_v12 = vpop.eup %2258  ;;  %v1110_v15 = vmul.f32 %v2257_v3, %v2592_v24  ;;  %v584_v17 = vmul.f32 1.442695, %v465_v63  ;;  %v402_v18 = vmul.f32 %v337_v2, %v337_v2  ;;  %v1309_v21 = vadd.f32 %v2600_v33, %v1243_v0 }
 0x177   : > { %v2261_v19 = vpop.eup %2260  ;;  %v1628_v22 = vmul.f32 %v2259_v12, %v2602_v36  ;;  %v1038_v8 = vmul.f32 1.442695, %v919_v4  ;;  %v1437_v10 = vsub.f32 0.0, %v1373_v6  ;;  %v856_v25 = vmul.f32 %v791_v7, %v791_v7 }
 0x178   : > { %v2263_v26 = vpop.eup %2262  ;;  %v1174_v27 = vadd.f32 %v1110_v15, %v656_v14  ;;  %v657_v29 = vmul.f32 %v2261_v19, %v2572_v11  ;;  %2266 = vpow2.f32 %v584_v17  ;;  %v466_v23 = vsub.f32 0.0, %v402_v18 }
 0x179   : > { %v1111_v30 = vmul.f32 %v2263_v26, %v2592_v24  ;;  %2268 = vpow2.f32 %v1038_v8  ;;  %v1556_v31 = vmul.f32 1.442695, %v1437_v10  ;;  %v920_v32 = vsub.f32 0.0, %v856_v25 }
 0x17a   : > { %v1692_v37 = vadd.f32 %v1628_v22, %v1174_v27  ;;  %v586_v38 = vmul.f32 1.442695, %v466_v23  ;;  %v1374_v39 = vmul.f32 %v1309_v21, %v1309_v21  ;;  %v272_v34 = vmul.f32 %v2554_v1, %v206_v13  ;;  %v208_v22 = vld [vmem:[%s2547_s30 + $0x1d8] sm:$0xff] }
 0x17b   : > { %v2265_v35 = vpop.eup %2264  ;;  %v1175_v41 = vadd.f32 %v1111_v30, %v657_v29  ;;  %2270 = vpow2.f32 %v1556_v31  ;;  %v1040_v42 = vmul.f32 1.442695, %v920_v32  ;;  %v726_v43 = vmul.f32 %v2583_v16, %v206_v13  ;;  %v209_v29 = vld [vmem:[%s2547_s30 + $0x1e0] sm:$0xff] }
 0x17c   : > { %1756 = vst [vmem:[%s2636_s11 + $0x1a8] sm:$0xff] %v1692_v37  ;;  %v1629_v44 = vmul.f32 %v2265_v35, %v2602_v36  ;;  %2272 = vpow2.f32 %v586_v38  ;;  %v1438_v45 = vsub.f32 0.0, %v1374_v39  ;;  %v338_v46 = vadd.f32 %v2559_v5, %v272_v34 }
 0x17d   : > { %2274 = vpow2.f32 %v1040_v42  ;;  %v792_v48 = vadd.f32 %v2588_v20, %v726_v43  ;;  %v1244_v47 = vmul.f32 %v2595_v28, %v206_v13  ;;  %v273_v49 = vmul.f32 %v2554_v1, %v207_v40 }
 0x17e   : > { %v2267_v50 = vpop.eup %2266  ;;  %v1693_v51 = vadd.f32 %v1629_v44, %v1175_v41  ;;  %v1558_v52 = vmul.f32 1.442695, %v1438_v45  ;;  %v403_v53 = vmul.f32 %v338_v46, %v338_v46  ;;  %v727_v9 = vmul.f32 %v2583_v16, %v207_v40 }
 0x17f   : > { %v2269_v54 = vpop.eup %2268  ;;  %v658_v55 = vmul.f32 %v2267_v50, %v2572_v11  ;;  %v857_v56 = vmul.f32 %v792_v48, %v792_v48  ;;  %v1310_v57 = vadd.f32 %v2600_v33, %v1244_v47  ;;  %v339_v58 = vadd.f32 %v2559_v5, %v273_v49 }
 0x180   : > { %1757 = vst [vmem:[%s2636_s11 + $0x1b0] sm:$0xff] %v1693_v51  ;;  %v1112_v59 = vmul.f32 %v2269_v54, %v2592_v24  ;;  %2276 = vpow2.f32 %v1558_v52  ;;  %v467_v60 = vsub.f32 0.0, %v403_v53  ;;  %v793_v61 = vadd.f32 %v2588_v20, %v727_v9 }
 0x181   : > { %v2271_v62 = vpop.eup %2270  ;;  %v921_v14 = vsub.f32 0.0, %v857_v56  ;;  %v1375_v63 = vmul.f32 %v1310_v57, %v1310_v57  ;;  %v404_v2 = vmul.f32 %v339_v58, %v339_v58  ;;  %v1245_v0 = vmul.f32 %v2595_v28, %v207_v40 }
 0x182   : > { %v2273_v3 = vpop.eup %2272  ;;  %v1176_v4 = vadd.f32 %v1112_v59, %v658_v55  ;;  %v1630_v6 = vmul.f32 %v2271_v62, %v2602_v36  ;;  %v588_v7 = vmul.f32 1.442695, %v467_v60  ;;  %v858_v12 = vmul.f32 %v793_v61, %v793_v61 }
 0x183   : > { %v2275_v15 = vpop.eup %2274  ;;  %v659_v17 = vmul.f32 %v2273_v3, %v2572_v11  ;;  %v1042_v18 = vmul.f32 1.442695, %v921_v14  ;;  %v1439_v21 = vsub.f32 0.0, %v1375_v63  ;;  %v468_v19 = vsub.f32 0.0, %v404_v2  ;;  %v210_v3 = vld [vmem:[%s2547_s30 + $0x1e8] sm:$0xff] }
 0x184   : > { %v1694_v8 = vadd.f32 %v1630_v6, %v1176_v4  ;;  %v1113_v10 = vmul.f32 %v2275_v15, %v2592_v24  ;;  %2278 = vpow2.f32 %v588_v7  ;;  %v922_v25 = vsub.f32 0.0, %v858_v12 }
 0x185   : > { %2280 = vpow2.f32 %v1042_v18  ;;  %v1560_v13 = vmul.f32 1.442695, %v1439_v21  ;;  %v590_v26 = vmul.f32 1.442695, %v468_v19  ;;  %v1311_v27 = vadd.f32 %v2600_v33, %v1245_v0 }
 0x186   : > { %v2277_v23 = vpop.eup %2276  ;;  %1758 = vst [vmem:[%s2636_s11 + $0x1b8] sm:$0xff] %v1694_v8  ;;  %v1177_v30 = vadd.f32 %v1113_v10, %v659_v17  ;;  %v1044_v31 = vmul.f32 1.442695, %v922_v25  ;;  %v274_v32 = vmul.f32 %v2554_v1, %v208_v22  ;;  %v728_v37 = vmul.f32 %v2583_v16, %v208_v22  ;;  %v211_v10 = vld [vmem:[%s2547_s30 + $0x1f0] sm:$0xff] }
 0x187   : > { %v1631_v38 = vmul.f32 %v2277_v23, %v2602_v36  ;;  %2282 = vpow2.f32 %v1560_v13  ;;  %v1376_v39 = vmul.f32 %v1311_v27, %v1311_v27  ;;  %v1246_v34 = vmul.f32 %v2595_v28, %v208_v22 }
 0x188   : > { %2284 = vpow2.f32 %v590_v26  ;;  %v340_v40 = vadd.f32 %v2559_v5, %v274_v32  ;;  %v794_v35 = vadd.f32 %v2588_v20, %v728_v37  ;;  %v275_v41 = vmul.f32 %v2554_v1, %v209_v29 }
 0x189   : > { %v1695_v42 = vadd.f32 %v1631_v38, %v1177_v30  ;;  %2286 = vpow2.f32 %v1044_v31  ;;  %v1440_v43 = vsub.f32 0.0, %v1376_v39  ;;  %v1312_v44 = vadd.f32 %v2600_v33, %v1246_v34 }
 0x18a   : > { %v2279_v45 = vpop.eup %2278  ;;  %v405_v46 = vmul.f32 %v340_v40, %v340_v40  ;;  %v859_v48 = vmul.f32 %v794_v35, %v794_v35  ;;  %v341_v47 = vadd.f32 %v2559_v5, %v275_v41  ;;  %v729_v49 = vmul.f32 %v2583_v16, %v209_v29 }
 0x18b   : > { %v2281_v50 = vpop.eup %2280  ;;  %1759 = vst [vmem:[%s2636_s11 + $0x1c0] sm:$0xff] %v1695_v42  ;;  %v660_v51 = vmul.f32 %v2279_v45, %v2572_v11  ;;  %v1562_v52 = vmul.f32 1.442695, %v1440_v43  ;;  %v1377_v53 = vmul.f32 %v1312_v44, %v1312_v44  ;;  %v1247_v9 = vmul.f32 %v2595_v28, %v209_v29 }
 0x18c   : > { %v1114_v54 = vmul.f32 %v2281_v50, %v2592_v24  ;;  %v469_v55 = vsub.f32 0.0, %v405_v46  ;;  %v923_v56 = vsub.f32 0.0, %v859_v48  ;;  %v406_v57 = vmul.f32 %v341_v47, %v341_v47 }
 0x18d   : > { %v2283_v58 = vpop.eup %2282  ;;  %2288 = vpow2.f32 %v1562_v52  ;;  %v1441_v59 = vsub.f32 0.0, %v1377_v53  ;;  %v795_v60 = vadd.f32 %v2588_v20, %v729_v49  ;;  %v1313_v61 = vadd.f32 %v2600_v33, %v1247_v9 }
 0x18e   : > { %v2285_v62 = vpop.eup %2284  ;;  %v1178_v14 = vadd.f32 %v1114_v54, %v660_v51  ;;  %v1632_v63 = vmul.f32 %v2283_v58, %v2602_v36  ;;  %v592_v2 = vmul.f32 1.442695, %v469_v55  ;;  %v1046_v0 = vmul.f32 1.442695, %v923_v56 }
 0x18f   : > { %v2287_v4 = vpop.eup %2286  ;;  %v661_v6 = vmul.f32 %v2285_v62, %v2572_v11  ;;  %v1564_v7 = vmul.f32 1.442695, %v1441_v59  ;;  %v470_v12 = vsub.f32 0.0, %v406_v57  ;;  %v860_v15 = vmul.f32 %v795_v60, %v795_v60 }
 0x190   : > { %v1696_v17 = vadd.f32 %v1632_v63, %v1178_v14  ;;  %v1115_v18 = vmul.f32 %v2287_v4, %v2592_v24  ;;  %2290 = vpow2.f32 %v592_v2  ;;  %v1378_v21 = vmul.f32 %v1313_v61, %v1313_v61 }
 0x191   : > { %2292 = vpow2.f32 %v1046_v0  ;;  %v594_v19 = vmul.f32 1.442695, %v470_v12  ;;  %v924_v22 = vsub.f32 0.0, %v860_v15  ;;  %v276_v8 = vmul.f32 %v2554_v1, %v210_v3  ;;  %v212_v0 = vld [vmem:[%s2547_s30 + $0x1f8] sm:$0xff] }
 0x192   : > { %1760 = vst [vmem:[%s2636_s11 + $0x1c8] sm:$0xff] %v1696_v17  ;;  %v1179_v25 = vadd.f32 %v1115_v18, %v661_v6  ;;  %2294 = vpow2.f32 %v1564_v7  ;;  %v1442_v13 = vsub.f32 0.0, %v1378_v21  ;;  %v730_v26 = vmul.f32 %v2583_v16, %v210_v3 }
 0x193   : > { %v2289_v27 = vpop.eup %2288  ;;  %2296 = vpow2.f32 %v594_v19  ;;  %v1048_v29 = vmul.f32 1.442695, %v924_v22  ;;  %v342_v23 = vadd.f32 %v2559_v5, %v276_v8  ;;  %v1248_v30 = vmul.f32 %v2595_v28, %v210_v3 }
 0x194   : > { %v1633_v31 = vmul.f32 %v2289_v27, %v2602_v36  ;;  %v1566_v32 = vmul.f32 1.442695, %v1442_v13  ;;  %v796_v37 = vadd.f32 %v2588_v20, %v730_v26  ;;  %v277_v38 = vmul.f32 %v2554_v1, %v211_v10 }
 0x195   : > { %2298 = vpow2.f32 %v1048_v29  ;;  %v407_v39 = vmul.f32 %v342_v23, %v342_v23  ;;  %v1314_v34 = vadd.f32 %v2600_v33, %v1248_v30  ;;  %v731_v40 = vmul.f32 %v2583_v16, %v211_v10 }
 0x196   : > { %v2291_v35 = vpop.eup %2290  ;;  %v1697_v41 = vadd.f32 %v1633_v31, %v1179_v25  ;;  %2300 = vpow2.f32 %v1566_v32  ;;  %v861_v42 = vmul.f32 %v796_v37, %v796_v37  ;;  %v343_v43 = vadd.f32 %v2559_v5, %v277_v38 }
 0x197   : > { %v2293_v44 = vpop.eup %2292  ;;  %v662_v45 = vmul.f32 %v2291_v35, %v2572_v11  ;;  %v471_v46 = vsub.f32 0.0, %v407_v39  ;;  %v1379_v48 = vmul.f32 %v1314_v34, %v1314_v34  ;;  %v797_v47 = vadd.f32 %v2588_v20, %v731_v40 }
 0x198   : > { %v2295_v49 = vpop.eup %2294  ;;  %1761 = vst [vmem:[%s2636_s11 + $0x1d0] sm:$0xff] %v1697_v41  ;;  %v1116_v50 = vmul.f32 %v2293_v44, %v2592_v24  ;;  %v925_v51 = vsub.f32 0.0, %v861_v42  ;;  %v408_v52 = vmul.f32 %v343_v43, %v343_v43  ;;  %v1249_v53 = vmul.f32 %v2595_v28, %v211_v10 }
 0x199   : > { %v2297_v9 = vpop.eup %2296  ;;  %v1634_v54 = vmul.f32 %v2295_v49, %v2602_v36  ;;  %v596_v55 = vmul.f32 1.442695, %v471_v46  ;;  %v1443_v56 = vsub.f32 0.0, %v1379_v48  ;;  %v862_v57 = vmul.f32 %v797_v47, %v797_v47 }
 0x19a   : > { %v1180_v58 = vadd.f32 %v1116_v50, %v662_v45  ;;  %v663_v59 = vmul.f32 %v2297_v9, %v2572_v11  ;;  %v1050_v60 = vmul.f32 1.442695, %v925_v51  ;;  %v472_v61 = vsub.f32 0.0, %v408_v52 }
 0x19b   : > { %v2299_v62 = vpop.eup %2298  ;;  %2302 = vpow2.f32 %v596_v55  ;;  %v1568_v14 = vmul.f32 1.442695, %v1443_v56  ;;  %v926_v63 = vsub.f32 0.0, %v862_v57  ;;  %v1315_v2 = vadd.f32 %v2600_v33, %v1249_v53 }
 0x19c   : > { %v2301_v3 = vpop.eup %2300  ;;  %v1698_v4 = vadd.f32 %v1634_v54, %v1180_v58  ;;  %v1117_v6 = vmul.f32 %v2299_v62, %v2592_v24  ;;  %2304 = vpow2.f32 %v1050_v60  ;;  %v598_v7 = vmul.f32 1.442695, %v472_v61 }
 0x19d   : > { %v1635_v12 = vmul.f32 %v2301_v3, %v2602_v36  ;;  %2306 = vpow2.f32 %v1568_v14  ;;  %v1052_v15 = vmul.f32 1.442695, %v926_v63  ;;  %v1380_v17 = vmul.f32 %v1315_v2, %v1315_v2 }
 0x19e   : > { %1762 = vst [vmem:[%s2636_s11 + $0x1d8] sm:$0xff] %v1698_v4  ;;  %v1181_v18 = vadd.f32 %v1117_v6, %v663_v59  ;;  %2308 = vpow2.f32 %v598_v7  ;;  %v278_v21 = vmul.f32 %v2554_v1, %v212_v0  ;;  %v732_v19 = vmul.f32 %v2583_v16, %v212_v0 }
 0x19f   : > { %2310 = vpow2.f32 %v1052_v15  ;;  %v1444_v22 = vsub.f32 0.0, %v1380_v17  ;;  %v1250_v8 = vmul.f32 %v2595_v28, %v212_v0 }
 0x1a0   : > { %v1699_v10 = vadd.f32 %v1635_v12, %v1181_v18  ;;  %v344_v25 = vadd.f32 %v2559_v5, %v278_v21  ;;  %v798_v13 = vadd.f32 %v2588_v20, %v732_v19 }
 0x1a1   : > { %v2303_v26 = vpop.eup %2302  ;;  %v1570_v27 = vmul.f32 1.442695, %v1444_v22  ;;  %v1316_v29 = vadd.f32 %v2600_v33, %v1250_v8 }
 0x1a2   : > { %v2305_v23 = vpop.eup %2304  ;;  %1763 = vst [vmem:[%s2636_s11 + $0x1e0] sm:$0xff] %v1699_v10  ;;  %v664_v30 = vmul.f32 %v2303_v26, %v2572_v11  ;;  %v409_v1 = vmul.f32 %v344_v25, %v344_v25  ;;  %v863_v31 = vmul.f32 %v798_v13, %v798_v13 }
 0x1a3   : > { %v2307_v16 = vpop.eup %2306  ;;  %v1118_v32 = vmul.f32 %v2305_v23, %v2592_v24  ;;  %2312 = vpow2.f32 %v1570_v27  ;;  %v1381_v28 = vmul.f32 %v1316_v29, %v1316_v29 }
 0x1a4   : > { %v2309_v37 = vpop.eup %2308  ;;  %v1636_v5 = vmul.f32 %v2307_v16, %v2602_v36  ;;  %v473_v20 = vsub.f32 0.0, %v409_v1  ;;  %v927_v38 = vsub.f32 0.0, %v863_v31 }
 0x1a5   : > { %v2311_v39 = vpop.eup %2310  ;;  %v1182_v33 = vadd.f32 %v1118_v32, %v664_v30  ;;  %v665_v34 = vmul.f32 %v2309_v37, %v2572_v11  ;;  %v1445_v40 = vsub.f32 0.0, %v1381_v28 }
 0x1a6   : > { %v1119_v35 = vmul.f32 %v2311_v39, %v2592_v24  ;;  %v600_v41 = vmul.f32 1.442695, %v473_v20  ;;  %v1054_v42 = vmul.f32 1.442695, %v927_v38 }
 0x1a7   : > { %v1700_v43 = vadd.f32 %v1636_v5, %v1182_v33  ;;  %v1572_v44 = vmul.f32 1.442695, %v1445_v40 }
 0x1a8   : > { %v1183_v45 = vadd.f32 %v1119_v35, %v665_v34  ;;  %2314 = vpow2.f32 %v600_v41 }
 0x1a9   : > { %v2313_v46 = vpop.eup %2312  ;;  %1764 = vst [vmem:[%s2636_s11 + $0x1e8] sm:$0xff] %v1700_v43  ;;  %2316 = vpow2.f32 %v1054_v42 }
 0x1aa   : > { %v1637_v48 = vmul.f32 %v2313_v46, %v2602_v36  ;;  %2318 = vpow2.f32 %v1572_v44 }
 0x1ac   : > { %v1701_v47 = vadd.f32 %v1637_v48, %v1183_v45 }
 0x1ae   : > { %v2315_v49 = vpop.eup %2314  ;;  %1765 = vst [vmem:[%s2636_s11 + $0x1f0] sm:$0xff] %v1701_v47 }
 0x1af   : > { %v2317_v50 = vpop.eup %2316  ;;  %v666_v51 = vmul.f32 %v2315_v49, %v2572_v11 }
 0x1b0   : > { %v2319_v52 = vpop.eup %2318  ;;  %v1120_v53 = vmul.f32 %v2317_v50, %v2592_v24 }
 0x1b1   : > { %v1638_v9 = vmul.f32 %v2319_v52, %v2602_v36 }
 0x1b2   : > { %v1184_v54 = vadd.f32 %v1120_v53, %v666_v51 }
 0x1b4   : > { %v1702_v55 = vadd.f32 %v1638_v9, %v1184_v54 }
 0x1b6   : > { %1766 = vst [vmem:[%s2636_s11 + $0x1f8] sm:$0xff] %v1702_v55 }
 0x1b7   : > { %2389 = shalt.err (!%p2386_p4)
}
 0x1b8   : > { %s2435_s27 = smov 512   ;;  %s2436_s7 = smov 32  }
 0x1b9   : > { %1887 = dma.vmem_to_hbm [thread:$0]  (%p2505_p11), %s1782_s22, 8192, %s1784_s26, %s1768_s0, %s2435_s27, %s2435_s27, %s2436_s7  }
 0x1ba PF: > { %s1798_s8 = sand.u32 1, %s2418_s13   ;;  %p3339_p7 = scmp.ge.s32.totalorder %s2430_s16, 2 }
 0x1bb   : > { %s1799_s9 = scalar_lea.sflag [#allocation6], %s1798_s8 }
 0x1bc   : > { %p1894_p5 = pnand %p3339_p7, %p2509_p12 }
 0x1be   : > { %p1895_p8 = pneg %p1894_p5 }
 0x1c0   : > { %2413 = dma.done.wait (%p1895_p8), %s1799_s9, 8192  }
 0x1c1   : > { %2415 = vsyncadd (%p1895_p8), %s1799_s9, 4294959104  ;;  %p23_p10 = scmp.ge.s32.totalorder %s2480_s18, 4   ;;  %s3340_s13 = smov %s2422_s14 }
 0x1c2   : > { %s3341_s14 = smov %s2426_s15  ;;  %s3342_s15 = smov %s2492_s21 }
 0x1c3   : > { %s3343_s16 = smov %s2480_s18  ;;  %25 = sbr.rel (!%p23_p10) target bundleno = 11 (0xb), region = 69 }
 0x1c8   :  { %1805 = vsyncpa [#allocation5], 1 }
 0x1c9   :  { %1807 = vsyncpa [#allocation5 + $0x1], 1 }
 0x1ca   :  { %1808 = vsyncpa [#allocation6], 1 }
 0x1cb   :  { %1810 = vsyncpa [#allocation6 + $0x1], 1 }

</bundles_post_ra>
